<compile_context>
chip_gen: v7x
topology: tpu7x:2x2x1
jax: 0.10.0
libtpu: 0.0.40
codegen_flags: <defaults>
</compile_context>

<pallas_src>
import functools

import jax
import jax.numpy as jnp
from jax.experimental import pallas as pl
from jax.experimental.pallas import tpu as pltpu

BN_EPS = 1e-5
SOFTPLUS_THRESH = 20.0  # matches torch.nn.Softplus default threshold


# ---------------------------------------------------------------------------
# Kernel
# ---------------------------------------------------------------------------
def encoder_kernel(x_ref, w1_ref, w234_ref, w5_ref, wh_ref, sprm_ref, out_ref,
                   *, z_dim):
    # Small-parameter pack, loaded once (hoisted): rows 0-4 gamma, 5-9 beta,
    # row 10 fused head bias.  All f32.
    sprm = sprm_ref[...]
    w_dtype = w1_ref.dtype

    def bn_relu(y, idx, d_out):
        # One-pass training-mode BatchNorm statistics (biased variance, f32),
        # affine folded into a single FMA, then ReLU, then cast to the matmul
        # dtype so only narrow activation vregs stay live between layers.
        inv_b = 1.0 / y.shape[0]
        s1 = jnp.sum(y, axis=0, keepdims=True)
        s2 = jnp.sum(y * y, axis=0, keepdims=True)
        mean = s1 * inv_b
        var = s2 * inv_b - mean * mean
        scale = sprm[idx:idx + 1, :d_out] * jax.lax.rsqrt(var + BN_EPS)
        shift = sprm[5 + idx:6 + idx, :d_out] - mean * scale
        return jnp.maximum(y * scale + shift, 0.0).astype(w_dtype)

    # Layer 1: natural (unpadded) input rows; Mosaic masks the short K dim.
    w1 = w1_ref[...]
    y = jnp.dot(x_ref[...].astype(w_dtype), w1, preferred_element_type=jnp.float32)
    h = bn_relu(y, 0, w1.shape[1])

    # Layers 2-4: packed (3, 128, 128) weight operand, static index.
    for i in range(3):
        w = w234_ref[i]
        y = jnp.dot(h, w, preferred_element_type=jnp.float32)
        h = bn_relu(y, 1 + i, w.shape[1])

    # Layer 5 (hidden -> 256).
    w5 = w5_ref[...]
    y = jnp.dot(h, w5, preferred_element_type=jnp.float32)
    h = bn_relu(y, 4, w5.shape[1])

    # Fused mu/var head: one MXU pass, one lane-dense store.
    wh = wh_ref[...]
    head_pad = wh.shape[1]
    y = jnp.dot(h, wh, preferred_element_type=jnp.float32) + sprm[10:11, :head_pad]
    lane = jax.lax.broadcasted_iota(jnp.int32, y.shape, 1)
    is_var = (lane >= z_dim) & (lane < 2 * z_dim)
    # softplus with torch's threshold; the outer where is a select so the
    # overflowed exp branch is harmlessly discarded (inf, never NaN).
    sp_y = jnp.where(y > SOFTPLUS_THRESH, y, jnp.log1p(jnp.exp(y)))
    out_ref[...] = jnp.where(is_var, sp_y, y).astype(out_ref.dtype)


# ---------------------------------------------------------------------------
# Parameter packing (done once, outside the hot path)
# ---------------------------------------------------------------------------
def _rup(n, m=128):
    return ((n + m - 1) // m) * m


def _pad2(a, rows, cols):
    return jnp.pad(a, ((0, rows - a.shape[0]), (0, cols - a.shape[1])))


def pack_params(params, weight_dtype=jnp.bfloat16):
    """Pad / fuse the torch-layout parameters for the lane-dense kernel.

    `params` is the flat 24-array list from init_params (torch module layout,
    Linear weights pre-transposed to [in, out]).

    NOTE: hidden-layer Linear biases (params[4*i+1]) are intentionally unused.
    With TRAINING-mode BatchNorm the batch-mean subtraction cancels them
    exactly; this fold is NOT valid for eval-mode (running-stats) BN.
    """
    widths = [params[4 * i].shape[1] for i in range(5)]          # [H, H, H, H, 256]
    widths_pad = [_rup(w) for w in widths]
    assert widths_pad[0] == widths_pad[1] == widths_pad[2] == widths_pad[3]
    d_in = params[0].shape[0]                                    # natural, unpadded

    w1 = _pad2(params[0], d_in, widths_pad[0]).astype(weight_dtype)
    w234 = jnp.stack([
        _pad2(params[4 * i], widths_pad[i - 1], widths_pad[i]).astype(weight_dtype)
        for i in range(1, 4)
    ])
    w5 = _pad2(params[16], widths_pad[3], widths_pad[4]).astype(weight_dtype)

    # Fused mu/var head: one [256, 2*z_dim] weight, padded to 128 lanes.
    w_mu, b_mu, w_var, b_var = params[20:24]
    z_dim = w_mu.shape[1]
    head_pad = _rup(2 * z_dim)
    wh = _pad2(jnp.concatenate([w_mu, w_var], axis=1),
               widths_pad[4], head_pad).astype(weight_dtype)
    bh = jnp.concatenate([b_mu, b_var], axis=1).reshape(-1)

    # Small-parameter pack: rows 0-4 gamma, 5-9 beta, 10 head bias (f32).
    # Zero padding keeps padded lanes at exactly 0 through BN + ReLU.
    max_w = max(widths_pad + [head_pad])
    sprm = jnp.zeros((11, max_w), jnp.float32)
    for i in range(5):
        sprm = sprm.at[i, :widths[i]].set(params[4 * i + 2].reshape(-1))
        sprm = sprm.at[5 + i, :widths[i]].set(params[4 * i + 3].reshape(-1))
    sprm = sprm.at[10, :2 * z_dim].set(bh)

    return {"w1": w1, "w234": w234, "w5": w5, "wh": wh, "sprm": sprm}


# ---------------------------------------------------------------------------
# Forward wrapper
# ---------------------------------------------------------------------------
def encoder_forward(x, packed, *, z_dim):
    w1, w234, w5, wh, sprm = (packed["w1"], packed["w234"], packed["w5"],
                              packed["wh"], packed["sprm"])
    B = x.shape[0]                      # batch is NOT padded (BN batch statistics)
    head_pad = wh.shape[1]
    inputs = (x, w1, w234, w5, wh, sprm)

    # Advisory cost estimate so XLA can overlap this tiny call with neighbours.
    d_in, h1, h5 = x.shape[1], w1.shape[1], w5.shape[1]
    flops = 2 * B * (d_in * h1 + 3 * h1 * h1 + h1 * h5 + h5 * head_pad)
    transcendentals = 2 * B * head_pad + 4 * h1 + h5
    bytes_accessed = (sum(a.size * a.dtype.itemsize for a in inputs)
                      + B * head_pad * 4)

    vmem = pl.BlockSpec(memory_space=pltpu.MemorySpace.VMEM)
    out = pl.pallas_call(
        functools.partial(encoder_kernel, z_dim=z_dim),
        out_shape=jax.ShapeDtypeStruct((B, head_pad), jnp.float32),
        in_specs=[vmem] * len(inputs),
        out_specs=vmem,
        # Working set < 1 MiB; keep the scoped-VMEM reservation small so
        # surrounding fusions are not starved (matters on v7x's 64 MiB VMEM).
        compiler_params=pltpu.CompilerParams(vmem_limit_bytes=4 * 1024 * 1024),
        cost_estimate=pl.CostEstimate(
            flops=flops, transcendentals=transcendentals,
            bytes_accessed=bytes_accessed),
    )(*inputs)
    return out[:, :z_dim], out[:, z_dim: 2 * z_dim]


# ---------------------------------------------------------------------------
# Deterministic synthetic parameters (torch module shapes; weights pre-transposed)
# ---------------------------------------------------------------------------
def init_params(key, inp_dim, out_dim, hidden_dim, z_dim):
    dims = [inp_dim + out_dim] + [hidden_dim] * 4 + [256]
    params = []
    for i in range(5):
        d_in, d_out = dims[i], dims[i + 1]
        key, k1, k2, k3, k4 = jax.random.split(key, 5)
        params += [
            0.1 * jax.random.normal(k1, (d_in, d_out), jnp.float32),          # W (pre-T)
            0.1 * jax.random.normal(k2, (1, d_out), jnp.float32),             # b
            1.0 + 0.05 * jax.random.normal(k3, (1, d_out), jnp.float32),      # gamma
            0.05 * jax.random.normal(k4, (1, d_out), jnp.float32),            # beta
        ]
    key, k1, k2, k3, k4 = jax.random.split(key, 5)
    params += [
        0.1 * jax.random.normal(k1, (256, z_dim), jnp.float32),  # w_mu
        0.1 * jax.random.normal(k2, (1, z_dim), jnp.float32),    # b_mu
        0.1 * jax.random.normal(k3, (256, z_dim), jnp.float32),  # w_var
        0.1 * jax.random.normal(k4, (1, z_dim), jnp.float32),    # b_var
    ]
    return params


def encoder_reference(x, params):
    """Plain-JAX reference with the original torch semantics (incl. hidden biases)."""
    h = x
    for i in range(5):
        w, b, g, be = params[4 * i: 4 * i + 4]
        y = h @ w + b
        mean = jnp.mean(y, axis=0, keepdims=True)
        var = jnp.mean((y - mean) ** 2, axis=0, keepdims=True)  # biased (BN train mode)
        h = jnp.maximum((y - mean) * jax.lax.rsqrt(var + BN_EPS) * g + be, 0.0)
    w_mu, b_mu, w_var, b_var = params[20:24]
    mu = h @ w_mu + b_mu
    v = h @ w_var + b_var
    v_sp = jnp.where(v > SOFTPLUS_THRESH, v,
                     jnp.log1p(jnp.exp(jnp.minimum(v, SOFTPLUS_THRESH))))
    return mu, v_sp


if __name__ == "__main__":
    # B=128 fills the MXU rows / f32 sublane tiles; features stay small (32 in, 32 hidden).
    B, INP, OUT, HID, ZD = 128, 16, 16, 32, 8

    key = jax.random.PRNGKey(0)
    key, kx = jax.random.split(key)
    x = jax.random.normal(kx, (B, INP + OUT), jnp.float32)
    params = init_params(key, INP, OUT, HID, ZD)

    fwd = jax.jit(functools.partial(encoder_forward, z_dim=ZD))
    mu_ref, var_ref = encoder_reference(x, params)

    # f32 weights: strict check against the torch-semantics reference.
    packed_f32 = pack_params(params, weight_dtype=jnp.float32)
    mu, var = fwd(x, packed_f32)
    jax.block_until_ready((mu, var))
    assert mu.shape == (B, ZD) and var.shape == (B, ZD)
    assert jnp.allclose(mu, mu_ref, atol=1e-3, rtol=1e-3), float(jnp.max(jnp.abs(mu - mu_ref)))
    assert jnp.allclose(var, var_ref, atol=1e-3, rtol=1e-3), float(jnp.max(jnp.abs(var - var_ref)))
    assert bool(jnp.all(var > 0.0))  # softplus output is strictly positive

    # bf16 weights (default path, all TPU generations): loose-tolerance check
    # against the f32 reference so a packing/cast bug cannot hide.
    packed_bf16 = pack_params(params)  # default bf16
    mu16, var16 = fwd(x, packed_bf16)
    jax.block_until_ready((mu16, var16))
    assert mu16.shape == (B, ZD) and var16.shape == (B, ZD)
    scale = max(1.0, float(jnp.max(jnp.abs(mu_ref))), float(jnp.max(jnp.abs(var_ref))))
    tol16 = 0.15 * scale
    err_mu = float(jnp.max(jnp.abs(mu16 - mu_ref)))
    err_var = float(jnp.max(jnp.abs(var16 - var_ref)))
    assert err_mu < tol16, (err_mu, tol16)
    assert err_var < tol16, (err_var, tol16)
    assert bool(jnp.all(var16 > 0.0))

    print("KERNEL_OK")
</pallas_src>

<mosaic_0001>
module attributes {stable_mosaic.version = 11 : i64} {
  func.func @encoder_kernel(%arg0: memref<128x32xf32, #tpu.memory_space<vmem>>, %arg1: memref<32x128xf32, #tpu.memory_space<vmem>>, %arg2: memref<3x128x128xf32, #tpu.memory_space<vmem>>, %arg3: memref<128x256xf32, #tpu.memory_space<vmem>>, %arg4: memref<256x128xf32, #tpu.memory_space<vmem>>, %arg5: memref<11x256xf32, #tpu.memory_space<vmem>>, %arg6: memref<128x128xf32, #tpu.memory_space<vmem>>) attributes {dimension_semantics = [], scalar_prefetch = 0 : i64, scratch_operands = 0 : i64, tpu.core_type = #tpu.core_type<tc>} {
    %c0 = arith.constant 0 : index
    %c0_0 = arith.constant 0 : index
    %0 = vector.load %arg5[%c0, %c0_0] : memref<11x256xf32, #tpu.memory_space<vmem>>, vector<11x256xf32>
    %c0_1 = arith.constant 0 : index
    %c0_2 = arith.constant 0 : index
    %1 = vector.load %arg1[%c0_1, %c0_2] : memref<32x128xf32, #tpu.memory_space<vmem>>, vector<32x128xf32>
    %c0_3 = arith.constant 0 : index
    %c0_4 = arith.constant 0 : index
    %2 = vector.load %arg0[%c0_3, %c0_4] : memref<128x32xf32, #tpu.memory_space<vmem>>, vector<128x32xf32>
    %cst = arith.constant dense<0.000000e+00> : vector<128x128xf32>
    %3 = tpu.matmul %2, %1, %cst {dimension_numbers = #tpu.dot_dimension_numbers<[1], [0], [0], [1], [0, 0, 1, 1], [], []>} : vector<128x32xf32>, vector<32x128xf32>, vector<128x128xf32> -> vector<128x128xf32>
    %cst_5 = arith.constant dense<0.000000e+00> : vector<128xf32>
    %4 = vector.multi_reduction <add>, %3, %cst_5 [0] : vector<128x128xf32> to vector<128xf32>
    %5 = vector.shape_cast %4 : vector<128xf32> to vector<1x128xf32>
    %6 = arith.mulf %3, %3 : vector<128x128xf32>
    %cst_6 = arith.constant dense<0.000000e+00> : vector<128xf32>
    %7 = vector.multi_reduction <add>, %6, %cst_6 [0] : vector<128x128xf32> to vector<128xf32>
    %8 = vector.shape_cast %7 : vector<128xf32> to vector<1x128xf32>
    %cst_7 = arith.constant 7.812500e-03 : f32
    %9 = vector.broadcast %cst_7 : f32 to vector<1x128xf32>
    %10 = arith.mulf %5, %9 : vector<1x128xf32>
    %cst_8 = arith.constant 7.812500e-03 : f32
    %11 = vector.broadcast %cst_8 : f32 to vector<1x128xf32>
    %12 = arith.mulf %8, %11 : vector<1x128xf32>
    %13 = arith.mulf %10, %10 : vector<1x128xf32>
    %14 = arith.subf %12, %13 : vector<1x128xf32>
    %15 = vector.extract_strided_slice %0 {offsets = [0, 0], sizes = [1, 128], strides = [1, 1]} : vector<11x256xf32> to vector<1x128xf32>
    %cst_9 = arith.constant 9.99999974E-6 : f32
    %16 = vector.broadcast %cst_9 : f32 to vector<1x128xf32>
    %17 = arith.addf %14, %16 : vector<1x128xf32>
    %18 = math.rsqrt %17 : vector<1x128xf32>
    %19 = arith.mulf %15, %18 : vector<1x128xf32>
    %20 = vector.extract_strided_slice %0 {offsets = [5, 0], sizes = [1, 128], strides = [1, 1]} : vector<11x256xf32> to vector<1x128xf32>
    %21 = arith.mulf %10, %19 : vector<1x128xf32>
    %22 = arith.subf %20, %21 : vector<1x128xf32>
    %23 = vector.broadcast %19 : vector<1x128xf32> to vector<128x128xf32>
    %24 = arith.mulf %3, %23 : vector<128x128xf32>
    %25 = vector.broadcast %22 : vector<1x128xf32> to vector<128x128xf32>
    %26 = arith.addf %24, %25 : vector<128x128xf32>
    %cst_10 = arith.constant 0.000000e+00 : f32
    %27 = vector.broadcast %cst_10 : f32 to vector<128x128xf32>
    %28 = arith.maximumf %26, %27 : vector<128x128xf32>
    %c0_11 = arith.constant 0 : index
    %c0_12 = arith.constant 0 : index
    %c0_13 = arith.constant 0 : index
    %29 = vector.load %arg2[%c0_11, %c0_12, %c0_13] : memref<3x128x128xf32, #tpu.memory_space<vmem>>, vector<1x128x128xf32>
    %30 = vector.shape_cast %29 : vector<1x128x128xf32> to vector<128x128xf32>
    %cst_14 = arith.constant dense<0.000000e+00> : vector<128x128xf32>
    %31 = tpu.matmul %28, %30, %cst_14 {dimension_numbers = #tpu.dot_dimension_numbers<[1], [0], [0], [1], [0, 0, 1, 1], [], []>} : vector<128x128xf32>, vector<128x128xf32>, vector<128x128xf32> -> vector<128x128xf32>
    %cst_15 = arith.constant dense<0.000000e+00> : vector<128xf32>
    %32 = vector.multi_reduction <add>, %31, %cst_15 [0] : vector<128x128xf32> to vector<128xf32>
    %33 = vector.shape_cast %32 : vector<128xf32> to vector<1x128xf32>
    %34 = arith.mulf %31, %31 : vector<128x128xf32>
    %cst_16 = arith.constant dense<0.000000e+00> : vector<128xf32>
    %35 = vector.multi_reduction <add>, %34, %cst_16 [0] : vector<128x128xf32> to vector<128xf32>
    %36 = vector.shape_cast %35 : vector<128xf32> to vector<1x128xf32>
    %cst_17 = arith.constant 7.812500e-03 : f32
    %37 = vector.broadcast %cst_17 : f32 to vector<1x128xf32>
    %38 = arith.mulf %33, %37 : vector<1x128xf32>
    %cst_18 = arith.constant 7.812500e-03 : f32
    %39 = vector.broadcast %cst_18 : f32 to vector<1x128xf32>
    %40 = arith.mulf %36, %39 : vector<1x128xf32>
    %41 = arith.mulf %38, %38 : vector<1x128xf32>
    %42 = arith.subf %40, %41 : vector<1x128xf32>
    %43 = vector.extract_strided_slice %0 {offsets = [1, 0], sizes = [1, 128], strides = [1, 1]} : vector<11x256xf32> to vector<1x128xf32>
    %cst_19 = arith.constant 9.99999974E-6 : f32
    %44 = vector.broadcast %cst_19 : f32 to vector<1x128xf32>
    %45 = arith.addf %42, %44 : vector<1x128xf32>
    %46 = math.rsqrt %45 : vector<1x128xf32>
    %47 = arith.mulf %43, %46 : vector<1x128xf32>
    %48 = vector.extract_strided_slice %0 {offsets = [6, 0], sizes = [1, 128], strides = [1, 1]} : vector<11x256xf32> to vector<1x128xf32>
    %49 = arith.mulf %38, %47 : vector<1x128xf32>
    %50 = arith.subf %48, %49 : vector<1x128xf32>
    %51 = vector.broadcast %47 : vector<1x128xf32> to vector<128x128xf32>
    %52 = arith.mulf %31, %51 : vector<128x128xf32>
    %53 = vector.broadcast %50 : vector<1x128xf32> to vector<128x128xf32>
    %54 = arith.addf %52, %53 : vector<128x128xf32>
    %cst_20 = arith.constant 0.000000e+00 : f32
    %55 = vector.broadcast %cst_20 : f32 to vector<128x128xf32>
    %56 = arith.maximumf %54, %55 : vector<128x128xf32>
    %c1 = arith.constant 1 : index
    %c0_21 = arith.constant 0 : index
    %c0_22 = arith.constant 0 : index
    %57 = vector.load %arg2[%c1, %c0_21, %c0_22] : memref<3x128x128xf32, #tpu.memory_space<vmem>>, vector<1x128x128xf32>
    %58 = vector.shape_cast %57 : vector<1x128x128xf32> to vector<128x128xf32>
    %cst_23 = arith.constant dense<0.000000e+00> : vector<128x128xf32>
    %59 = tpu.matmul %56, %58, %cst_23 {dimension_numbers = #tpu.dot_dimension_numbers<[1], [0], [0], [1], [0, 0, 1, 1], [], []>} : vector<128x128xf32>, vector<128x128xf32>, vector<128x128xf32> -> vector<128x128xf32>
    %cst_24 = arith.constant dense<0.000000e+00> : vector<128xf32>
    %60 = vector.multi_reduction <add>, %59, %cst_24 [0] : vector<128x128xf32> to vector<128xf32>
    %61 = vector.shape_cast %60 : vector<128xf32> to vector<1x128xf32>
    %62 = arith.mulf %59, %59 : vector<128x128xf32>
    %cst_25 = arith.constant dense<0.000000e+00> : vector<128xf32>
    %63 = vector.multi_reduction <add>, %62, %cst_25 [0] : vector<128x128xf32> to vector<128xf32>
    %64 = vector.shape_cast %63 : vector<128xf32> to vector<1x128xf32>
    %cst_26 = arith.constant 7.812500e-03 : f32
    %65 = vector.broadcast %cst_26 : f32 to vector<1x128xf32>
    %66 = arith.mulf %61, %65 : vector<1x128xf32>
    %cst_27 = arith.constant 7.812500e-03 : f32
    %67 = vector.broadcast %cst_27 : f32 to vector<1x128xf32>
    %68 = arith.mulf %64, %67 : vector<1x128xf32>
    %69 = arith.mulf %66, %66 : vector<1x128xf32>
    %70 = arith.subf %68, %69 : vector<1x128xf32>
    %71 = vector.extract_strided_slice %0 {offsets = [2, 0], sizes = [1, 128], strides = [1, 1]} : vector<11x256xf32> to vector<1x128xf32>
    %cst_28 = arith.constant 9.99999974E-6 : f32
    %72 = vector.broadcast %cst_28 : f32 to vector<1x128xf32>
    %73 = arith.addf %70, %72 : vector<1x128xf32>
    %74 = math.rsqrt %73 : vector<1x128xf32>
    %75 = arith.mulf %71, %74 : vector<1x128xf32>
    %76 = vector.extract_strided_slice %0 {offsets = [7, 0], sizes = [1, 128], strides = [1, 1]} : vector<11x256xf32> to vector<1x128xf32>
    %77 = arith.mulf %66, %75 : vector<1x128xf32>
    %78 = arith.subf %76, %77 : vector<1x128xf32>
    %79 = vector.broadcast %75 : vector<1x128xf32> to vector<128x128xf32>
    %80 = arith.mulf %59, %79 : vector<128x128xf32>
    %81 = vector.broadcast %78 : vector<1x128xf32> to vector<128x128xf32>
    %82 = arith.addf %80, %81 : vector<128x128xf32>
    %cst_29 = arith.constant 0.000000e+00 : f32
    %83 = vector.broadcast %cst_29 : f32 to vector<128x128xf32>
    %84 = arith.maximumf %82, %83 : vector<128x128xf32>
    %c2 = arith.constant 2 : index
    %c0_30 = arith.constant 0 : index
    %c0_31 = arith.constant 0 : index
    %85 = vector.load %arg2[%c2, %c0_30, %c0_31] : memref<3x128x128xf32, #tpu.memory_space<vmem>>, vector<1x128x128xf32>
    %86 = vector.shape_cast %85 : vector<1x128x128xf32> to vector<128x128xf32>
    %cst_32 = arith.constant dense<0.000000e+00> : vector<128x128xf32>
    %87 = tpu.matmul %84, %86, %cst_32 {dimension_numbers = #tpu.dot_dimension_numbers<[1], [0], [0], [1], [0, 0, 1, 1], [], []>} : vector<128x128xf32>, vector<128x128xf32>, vector<128x128xf32> -> vector<128x128xf32>
    %cst_33 = arith.constant dense<0.000000e+00> : vector<128xf32>
    %88 = vector.multi_reduction <add>, %87, %cst_33 [0] : vector<128x128xf32> to vector<128xf32>
    %89 = vector.shape_cast %88 : vector<128xf32> to vector<1x128xf32>
    %90 = arith.mulf %87, %87 : vector<128x128xf32>
    %cst_34 = arith.constant dense<0.000000e+00> : vector<128xf32>
    %91 = vector.multi_reduction <add>, %90, %cst_34 [0] : vector<128x128xf32> to vector<128xf32>
    %92 = vector.shape_cast %91 : vector<128xf32> to vector<1x128xf32>
    %cst_35 = arith.constant 7.812500e-03 : f32
    %93 = vector.broadcast %cst_35 : f32 to vector<1x128xf32>
    %94 = arith.mulf %89, %93 : vector<1x128xf32>
    %cst_36 = arith.constant 7.812500e-03 : f32
    %95 = vector.broadcast %cst_36 : f32 to vector<1x128xf32>
    %96 = arith.mulf %92, %95 : vector<1x128xf32>
    %97 = arith.mulf %94, %94 : vector<1x128xf32>
    %98 = arith.subf %96, %97 : vector<1x128xf32>
    %99 = vector.extract_strided_slice %0 {offsets = [3, 0], sizes = [1, 128], strides = [1, 1]} : vector<11x256xf32> to vector<1x128xf32>
    %cst_37 = arith.constant 9.99999974E-6 : f32
    %100 = vector.broadcast %cst_37 : f32 to vector<1x128xf32>
    %101 = arith.addf %98, %100 : vector<1x128xf32>
    %102 = math.rsqrt %101 : vector<1x128xf32>
    %103 = arith.mulf %99, %102 : vector<1x128xf32>
    %104 = vector.extract_strided_slice %0 {offsets = [8, 0], sizes = [1, 128], strides = [1, 1]} : vector<11x256xf32> to vector<1x128xf32>
    %105 = arith.mulf %94, %103 : vector<1x128xf32>
    %106 = arith.subf %104, %105 : vector<1x128xf32>
    %107 = vector.broadcast %103 : vector<1x128xf32> to vector<128x128xf32>
    %108 = arith.mulf %87, %107 : vector<128x128xf32>
    %109 = vector.broadcast %106 : vector<1x128xf32> to vector<128x128xf32>
    %110 = arith.addf %108, %109 : vector<128x128xf32>
    %cst_38 = arith.constant 0.000000e+00 : f32
    %111 = vector.broadcast %cst_38 : f32 to vector<128x128xf32>
    %112 = arith.maximumf %110, %111 : vector<128x128xf32>
    %c0_39 = arith.constant 0 : index
    %c0_40 = arith.constant 0 : index
    %113 = vector.load %arg3[%c0_39, %c0_40] : memref<128x256xf32, #tpu.memory_space<vmem>>, vector<128x256xf32>
    %cst_41 = arith.constant dense<0.000000e+00> : vector<128x256xf32>
    %114 = tpu.matmul %112, %113, %cst_41 {dimension_numbers = #tpu.dot_dimension_numbers<[1], [0], [0], [1], [0, 0, 1, 1], [], []>} : vector<128x128xf32>, vector<128x256xf32>, vector<128x256xf32> -> vector<128x256xf32>
    %cst_42 = arith.constant dense<0.000000e+00> : vector<256xf32>
    %115 = vector.multi_reduction <add>, %114, %cst_42 [0] : vector<128x256xf32> to vector<256xf32>
    %116 = vector.shape_cast %115 : vector<256xf32> to vector<1x256xf32>
    %117 = arith.mulf %114, %114 : vector<128x256xf32>
    %cst_43 = arith.constant dense<0.000000e+00> : vector<256xf32>
    %118 = vector.multi_reduction <add>, %117, %cst_43 [0] : vector<128x256xf32> to vector<256xf32>
    %119 = vector.shape_cast %118 : vector<256xf32> to vector<1x256xf32>
    %cst_44 = arith.constant 7.812500e-03 : f32
    %120 = vector.broadcast %cst_44 : f32 to vector<1x256xf32>
    %121 = arith.mulf %116, %120 : vector<1x256xf32>
    %cst_45 = arith.constant 7.812500e-03 : f32
    %122 = vector.broadcast %cst_45 : f32 to vector<1x256xf32>
    %123 = arith.mulf %119, %122 : vector<1x256xf32>
    %124 = arith.mulf %121, %121 : vector<1x256xf32>
    %125 = arith.subf %123, %124 : vector<1x256xf32>
    %126 = vector.extract_strided_slice %0 {offsets = [4, 0], sizes = [1, 256], strides = [1, 1]} : vector<11x256xf32> to vector<1x256xf32>
    %cst_46 = arith.constant 9.99999974E-6 : f32
    %127 = vector.broadcast %cst_46 : f32 to vector<1x256xf32>
    %128 = arith.addf %125, %127 : vector<1x256xf32>
    %129 = math.rsqrt %128 : vector<1x256xf32>
    %130 = arith.mulf %126, %129 : vector<1x256xf32>
    %131 = vector.extract_strided_slice %0 {offsets = [9, 0], sizes = [1, 256], strides = [1, 1]} : vector<11x256xf32> to vector<1x256xf32>
    %132 = arith.mulf %121, %130 : vector<1x256xf32>
    %133 = arith.subf %131, %132 : vector<1x256xf32>
    %134 = vector.broadcast %130 : vector<1x256xf32> to vector<128x256xf32>
    %135 = arith.mulf %114, %134 : vector<128x256xf32>
    %136 = vector.broadcast %133 : vector<1x256xf32> to vector<128x256xf32>
    %137 = arith.addf %135, %136 : vector<128x256xf32>
    %cst_47 = arith.constant 0.000000e+00 : f32
    %138 = vector.broadcast %cst_47 : f32 to vector<128x256xf32>
    %139 = arith.maximumf %137, %138 : vector<128x256xf32>
    %c0_48 = arith.constant 0 : index
    %c0_49 = arith.constant 0 : index
    %140 = vector.load %arg4[%c0_48, %c0_49] : memref<256x128xf32, #tpu.memory_space<vmem>>, vector<256x128xf32>
    %cst_50 = arith.constant dense<0.000000e+00> : vector<128x128xf32>
    %141 = tpu.matmul %139, %140, %cst_50 {dimension_numbers = #tpu.dot_dimension_numbers<[1], [0], [0], [1], [0, 0, 1, 1], [], []>} : vector<128x256xf32>, vector<256x128xf32>, vector<128x128xf32> -> vector<128x128xf32>
    %142 = vector.extract_strided_slice %0 {offsets = [10, 0], sizes = [1, 128], strides = [1, 1]} : vector<11x256xf32> to vector<1x128xf32>
    %143 = vector.broadcast %142 : vector<1x128xf32> to vector<128x128xf32>
    %144 = arith.addf %141, %143 : vector<128x128xf32>
    %145 = tpu.iota {dimensions = array<i32: 1>} : vector<128x128xi32>
    %c8_i32 = arith.constant 8 : i32
    %146 = vector.broadcast %c8_i32 : i32 to vector<128x128xi32>
    %147 = arith.cmpi sge, %145, %146 : vector<128x128xi32>
    %c16_i32 = arith.constant 16 : i32
    %148 = vector.broadcast %c16_i32 : i32 to vector<128x128xi32>
    %149 = arith.cmpi slt, %145, %148 : vector<128x128xi32>
    %150 = arith.andi %147, %149 : vector<128x128xi1>
    %cst_51 = arith.constant 2.000000e+01 : f32
    %151 = vector.broadcast %cst_51 : f32 to vector<128x128xf32>
    %152 = arith.cmpf ogt, %144, %151 : vector<128x128xf32>
    %153 = math.exp %144 : vector<128x128xf32>
    %154 = math.log1p %153 : vector<128x128xf32>
    %155 = arith.select %152, %144, %154 : vector<128x128xi1>, vector<128x128xf32>
    %156 = arith.select %150, %155, %144 : vector<128x128xi1>, vector<128x128xf32>
    %c0_52 = arith.constant 0 : index
    %c0_53 = arith.constant 0 : index
    %157 = vector.load %arg6[%c0_52, %c0_53] : memref<128x128xf32, #tpu.memory_space<vmem>>, vector<128x128xf32>
    tpu.vector_store %arg6[%c0_52, %c0_53], %156 {strides = array<i32>} : memref<128x128xf32, #tpu.memory_space<vmem>>, vector<128x128xf32>,
    return
  }
}

</mosaic_0001>

<bundles_post_ra>
// kernel: encoder_forward.1
= control target key start
LH: loop header
LB: loop body
LE: loop exit
PB: predicated region body
PF: predicated region fallthrough
CT: control target
= control target key end

     0   :  { %11 = vsyncpa [#allocation3], 0  ;;  %s3951_s0 = inlined_call_operand.vmem [shape: f32[128,32], index: 0, kind: input, shape index: {}]   ;;  %s3952_s1 = inlined_call_operand.vmem [shape: f32[32,128], index: 1, kind: input, shape index: {}]   ;;  %s3953_s2 = inlined_call_operand.hbm [shape: f32[3,128,128], index: 2, kind: input, shape index: {}]   ;;  %s3954_s3 = inlined_call_operand.hbm [shape: f32[128,256], index: 3, kind: input, shape index: {}]   ;;  %s3955_s4 = inlined_call_operand.hbm [shape: f32[256,128], index: 4, kind: input, shape index: {}]   ;;  %s3956_s5 = inlined_call_operand.vmem [shape: f32[11,256], index: 5, kind: input, shape index: {}]   ;;  %s3957_s6 = inlined_call_operand.vmem [shape: f32[128,128], index: 6, kind: output, shape index: {}]  }
   0x1   :  { %12 = vsyncpa [#allocation5], 0  ;;  %s2899_s21 = smov [#allocation4]   ;;  %s2829_s25 = scalar_lea.hbm %s3954_s3, 4096 }
   0x2   :  { %s34_s22 = sshll.u32 %s2899_s21, 4  ;;  %p2830_p0 = scmp.ne.s32.totalorder %s3954_s3, %s2829_s25  ;;  %s35_s22 = int_to_ptr.vmem [resolvable:$true] %s34_s22 }
   0x3   :  { %p2833_p1 = scmp.lt.u32.totalorder %s2829_s25, %s3954_s3 }
   0x5   :  { %p2835_p2 = pnand %p2833_p1, %p2830_p0 }
   0x7   :  { %2838 = shalt.err (!%p2835_p2)
}
   0x8   :  { %s2839_s30 = scalar_lea.vmem %s35_s22, 4096  ;;  %p2844_p4 = scmp.lt.s32.totalorder %s35_s22, %s35_s22 }
   0x9   :  { %p2840_p3 = scmp.ne.s32.totalorder %s35_s22, %s2839_s30  ;;  %p2845_p5 = scmp.lt.s32.totalorder %s2839_s30, %s2839_s30 }
   0xb   :  { %p2846_p6 = por %p2845_p5, %p2844_p4 }
   0xd   :  { %p2847_p7 = pnand %p2846_p6, %p2840_p3 }
   0xf   :  { %2850 = shalt.err (!%p2847_p7)
}
  0x10   :  { %s2900_s7 = smov 256   ;;  %s2901_s8 = smov 16  }
  0x11   :  { %40 = dma.hbm_to_vmem [thread:$0]  %s3954_s3, 4096, %s35_s22, [#allocation5], %s2900_s7, %s2900_s7, %s2901_s8  }
  0x12   :  { %s2902_s11 = smov [#allocation2]   ;;  %s2851_s15 = scalar_lea.hbm %s3953_s2, 6144 }
  0x13   :  { %s22_s12 = sshll.u32 %s2902_s11, 4  ;;  %p2852_p8 = scmp.ne.s32.totalorder %s3953_s2, %s2851_s15  ;;  %s23_s12 = int_to_ptr.vmem [resolvable:$true] %s22_s12 }
  0x14   :  { %p2855_p9 = scmp.lt.u32.totalorder %s2851_s15, %s3953_s2 }
  0x16   :  { %p2857_p10 = pnand %p2855_p9, %p2852_p8 }
  0x18   :  { %2860 = shalt.err (!%p2857_p10)
}
  0x19   :  { %s2861_s20 = scalar_lea.vmem %s23_s12, 6144  ;;  %p2866_p12 = scmp.lt.s32.totalorder %s23_s12, %s23_s12 }
  0x1a   :  { %p2862_p11 = scmp.ne.s32.totalorder %s23_s12, %s2861_s20  ;;  %p2867_p13 = scmp.lt.s32.totalorder %s2861_s20, %s2861_s20 }
  0x1c   :  { %p2868_p0 = por %p2867_p13, %p2866_p12 }
  0x1e   :  { %p2869_p1 = pnand %p2868_p0, %p2862_p11 }
  0x20   :  { %2872 = shalt.err (!%p2869_p1)
}
  0x21   :  { %s2903_s3 = smov 128   ;;  %s2904_s21 = smov 8  }
  0x22   :  { %28 = dma.hbm_to_vmem [thread:$0]  %s3953_s2, 6144, %s23_s12, [#allocation3], %s2903_s3, %s2903_s3, %s2904_s21  }
  0x23   :  { %s2905_s24 = smov [#allocation6]   ;;  %s2873_s28 = scalar_lea.hbm %s3955_s4, 4096 }
  0x24   :  { %s46_s25 = sshll.u32 %s2905_s24, 4  ;;  %p2874_p2 = scmp.ne.s32.totalorder %s3955_s4, %s2873_s28  ;;  %s47_s25 = int_to_ptr.vmem [resolvable:$true] %s46_s25 }
  0x25   :  { %p2877_p3 = scmp.lt.u32.totalorder %s2873_s28, %s3955_s4 }
  0x27   :  { %p2879_p4 = pnand %p2877_p3, %p2874_p2 }
  0x29   :  { %2882 = shalt.err (!%p2879_p4)
}
  0x2a   :  { %s2883_s9 = scalar_lea.vmem %s47_s25, 4096  ;;  %p2888_p6 = scmp.lt.s32.totalorder %s47_s25, %s47_s25 }
  0x2b   :  { %p2884_p5 = scmp.ne.s32.totalorder %s47_s25, %s2883_s9  ;;  %p2889_p7 = scmp.lt.s32.totalorder %s2883_s9, %s2883_s9 }
  0x2d   :  { %p2890_p8 = por %p2889_p7, %p2888_p6 }
  0x2f   :  { %p2891_p9 = pnand %p2890_p8, %p2884_p5 }
  0x31   :  { %2894 = shalt.err (!%p2891_p9)
}
  0x32   :  { %52 = dma.hbm_to_vmem [thread:$0]  %s3955_s4, 4096, %s47_s25, [#allocation5], %s2903_s3, %s2903_s3, %s2904_s21  }
  0x33   :  { %2895 = dma.done.wait [#allocation3], 6144  }
  0x34   :  { %2896 = vsyncadd [#allocation3], 4294961152 }
  0x35   :  { %2897 = dma.done.wait [#allocation5], 8192  }
  0x36   :  { %2898 = vsyncadd [#allocation5], 4294959104  ;;  %vm88_vm0 = vcmask 261120   ;;  %v68_v0 = vld [vmem:[%s3952_s1] sm:$0xff]  ;;  %v69_v1 = vld [vmem:[%s3952_s1 + $0x8] sm:$0xff] }
  0x37   :  { %v70_v2 = vld [vmem:[%s3952_s1 + $0x10] sm:$0xff]  ;;  %v2560_v3 = vpack.c.bf16 %v69_v1, %v68_v0  ;;  %v71_v4 = vld [vmem:[%s3952_s1 + $0x18] sm:$0xff]  ;;  %v72_v5 = vld [vmem:[%s3951_s0] sm:$0xff] }
  0x38   :  { %v2564_v6 = vpack.c.bf16 %v71_v4, %v70_v2  ;;  %2368 = vmatprep.mubr.msk.f32.mxu0 %vm88_vm0, %v72_v5  ;;  %v73_v7 = vld [vmem:[%s3951_s0 + $0x8] sm:$0xff]  ;;  %v74_v8 = vld [vmem:[%s3951_s0 + $0x10] sm:$0xff]  ;;  %v75_v9 = vld [vmem:[%s3951_s0 + $0x18] sm:$0xff] }
  0x39   :  { %2561 = vmatprep.subr.bf16.mxu0 %v2560_v3  ;;  %v76_v10 = vld [vmem:[%s3951_s0 + $0x20] sm:$0xff]  ;;  %v77_v11 = vld [vmem:[%s3951_s0 + $0x28] sm:$0xff]  ;;  %v78_v12 = vld [vmem:[%s3951_s0 + $0x30] sm:$0xff] }
  0x3a   :  { %2563 = vmatpush3.bf16.msra.mxu0 %v2560_v3  ;;  %v79_v13 = vld [vmem:[%s3951_s0 + $0x38] sm:$0xff]  ;;  %v80_v14 = vld [vmem:[%s3951_s0 + $0x40] sm:$0xff]  ;;  %v81_v15 = vld [vmem:[%s3951_s0 + $0x48] sm:$0xff] }
  0x3b   :  { %2565 = vmatprep.subr.bf16.mxu0 %v2564_v6  ;;  %v82_v16 = vld [vmem:[%s3951_s0 + $0x50] sm:$0xff]  ;;  %v83_v17 = vld [vmem:[%s3951_s0 + $0x58] sm:$0xff]  ;;  %v84_v18 = vld [vmem:[%s3951_s0 + $0x60] sm:$0xff] }
  0x3c   :  { %v85_v19 = vld [vmem:[%s3951_s0 + $0x68] sm:$0xff]  ;;  %v86_v20 = vld [vmem:[%s3951_s0 + $0x70] sm:$0xff]  ;;  %v87_v21 = vld [vmem:[%s3951_s0 + $0x78] sm:$0xff] }
  0x3d   :  { %v408_v22 = vld [vmem:[#allocation2] sm:$0xff]  ;;  %v409_v23 = vld [vmem:[#allocation2 + $0x8] sm:$0xff]  ;;  %v410_v25 = vld [vmem:[#allocation2 + $0x10] sm:$0xff] }
  0x3e   :  { %2567 = vmatpush3.bf16.msra.mxu0 %v2564_v6  ;;  %v2568_v24 = vpack.c.bf16 %v409_v23, %v408_v22  ;;  %v411_v26 = vld [vmem:[#allocation2 + $0x18] sm:$0xff]  ;;  %v412_v28 = vld [vmem:[#allocation2 + $0x20] sm:$0xff]  ;;  %v413_v29 = vld [vmem:[#allocation2 + $0x28] sm:$0xff] }
  0x3f   :  { %v2572_v27 = vpack.c.bf16 %v411_v26, %v410_v25  ;;  %v2576_v30 = vpack.c.bf16 %v413_v29, %v412_v28  ;;  %v414_v31 = vld [vmem:[#allocation2 + $0x30] sm:$0xff]  ;;  %v415_v32 = vld [vmem:[#allocation2 + $0x38] sm:$0xff]  ;;  %v416_v34 = vld [vmem:[#allocation2 + $0x40] sm:$0xff] }
  0x40   :  { %2569 = vmatprep.subr.bf16.mxu1 %v2568_v24  ;;  %v2580_v33 = vpack.c.bf16 %v415_v32, %v414_v31  ;;  %v417_v35 = vld [vmem:[#allocation2 + $0x48] sm:$0xff]  ;;  %v418_v37 = vld [vmem:[#allocation2 + $0x50] sm:$0xff]  ;;  %v419_v38 = vld [vmem:[#allocation2 + $0x58] sm:$0xff] }
  0x41   :  { %2369 = vmatmul.mubr.msk.f32.vlgmr.msra.gmra.mrb[0].mxu0 %vm88_vm0, %v73_v7  ;;  %2571 = vmatpush3.bf16.msra.mxu1 %v2568_v24  ;;  %v2584_v36 = vpack.c.bf16 %v417_v35, %v416_v34  ;;  %v2588_v39 = vpack.c.bf16 %v419_v38, %v418_v37  ;;  %v420_v40 = vld [vmem:[#allocation2 + $0x60] sm:$0xff]  ;;  %v421_v41 = vld [vmem:[#allocation2 + $0x68] sm:$0xff]  ;;  %v422_v43 = vld [vmem:[#allocation2 + $0x70] sm:$0xff] }
  0x42   :  { %2371 = vmatprep.mubr.msk.f32.mxu0 %vm88_vm0, %v74_v8  ;;  %2573 = vmatprep.subr.bf16.mxu1 %v2572_v27  ;;  %v2592_v42 = vpack.c.bf16 %v421_v41, %v420_v40  ;;  %v423_v44 = vld [vmem:[#allocation2 + $0x78] sm:$0xff] }
  0x43   :  { %v2596_v45 = vpack.c.bf16 %v423_v44, %v422_v43 }
  0x45   :  { %2372 = vmatmul.mubr.msk.f32.gmra.mrb[2].mxu0 %vm88_vm0, %v75_v9  ;;  %2575 = vmatpush3.bf16.msra.mxu1 %v2572_v27 }
  0x46   :  { %2374 = vmatprep.mubr.msk.f32.mxu0 %vm88_vm0, %v76_v10  ;;  %2577 = vmatprep.subr.bf16.mxu1 %v2576_v30 }
  0x49   :  { %2375 = vmatmul.mubr.msk.f32.gmra.mrb[4].mxu0 %vm88_vm0, %v77_v11  ;;  %2579 = vmatpush3.bf16.msra.mxu1 %v2576_v30 }
  0x4a   :  { %2377 = vmatprep.mubr.msk.f32.mxu0 %vm88_vm0, %v78_v12  ;;  %2581 = vmatprep.subr.bf16.mxu1 %v2580_v33 }
  0x4d   :  { %2378 = vmatmul.mubr.msk.f32.gmra.mrb[6].mxu0 %vm88_vm0, %v79_v13  ;;  %2583 = vmatpush3.bf16.msra.mxu1 %v2580_v33 }
  0x4e   :  { %2380 = vmatprep.mubr.msk.f32.mxu0 %vm88_vm0, %v80_v14  ;;  %2585 = vmatprep.subr.bf16.mxu1 %v2584_v36 }
  0x51   :  { %2381 = vmatmul.mubr.msk.f32.gmra.mrb[8].mxu0 %vm88_vm0, %v81_v15  ;;  %2587 = vmatpush3.bf16.msra.mxu1 %v2584_v36 }
  0x52   :  { %2383 = vmatprep.mubr.msk.f32.mxu0 %vm88_vm0, %v82_v16  ;;  %2589 = vmatprep.subr.bf16.mxu1 %v2588_v39 }
  0x55   :  { %2384 = vmatmul.mubr.msk.f32.gmra.mrb[10].mxu0 %vm88_vm0, %v83_v17  ;;  %2591 = vmatpush3.bf16.msra.mxu1 %v2588_v39 }
  0x56   :  { %2386 = vmatprep.mubr.msk.f32.mxu0 %vm88_vm0, %v84_v18  ;;  %2593 = vmatprep.subr.bf16.mxu1 %v2592_v42 }
  0x59   :  { %2387 = vmatmul.mubr.msk.f32.gmra.mrb[12].mxu0 %vm88_vm0, %v85_v19  ;;  %2595 = vmatpush3.bf16.msra.mxu1 %v2592_v42 }
  0x5a   :  { %2389 = vmatprep.mubr.msk.f32.mxu0 %vm88_vm0, %v86_v20  ;;  %2597 = vmatprep.subr.bf16.mxu1 %v2596_v45 }
  0x5d   :  { %2390 = vmatmul.mubr.msk.f32.gmra.mrb[14].mxu0 %vm88_vm0, %v87_v21  ;;  %2599 = vmatpush3.bf16.msra.mxu1 %v2596_v45 }
 0x114   :  { %v3054_v46 = vpop.f32.mrb[0].mxu0 }
 0x115   :  { %v304_v47 = vmul.f32 %v3054_v46, %v3054_v46  ;;  %v3058_v48 = vpop.f32.mrb[1].mxu0 }
 0x116   :  { %v282_v49 = vadd.f32 %v3054_v46, %v3058_v48  ;;  %v303_v50 = vmul.f32 %v3058_v48, %v3058_v48 }
 0x118   :  { %v319_v51 = vadd.f32 %v304_v47, %v303_v50  ;;  %v3064_v52 = vpop.f32.mrb[2].mxu0 }
 0x119   :  { %v3066_v53 = vpop.f32.mrb[3].mxu0  ;;  %v306_v56 = vmul.f32 %v3064_v52, %v3064_v52 }
 0x11a   :  { %v283_v54 = vadd.f32 %v282_v49, %v3066_v53  ;;  %v305_v55 = vmul.f32 %v3066_v53, %v3066_v53 }
 0x11c   :  { %v320_v57 = vadd.f32 %v319_v51, %v305_v55  ;;  %v3073_v58 = vpop.f32.mrb[4].mxu0  ;;  %v284_v59 = vadd.f32 %v3064_v52, %v283_v54 }
 0x11d   :  { %v3076_v60 = vpop.f32.mrb[5].mxu0  ;;  %v308_v0 = vmul.f32 %v3073_v58, %v3073_v58 }
 0x11e   :  { %v285_v61 = vadd.f32 %v284_v59, %v3076_v60  ;;  %v307_v62 = vmul.f32 %v3076_v60, %v3076_v60  ;;  %v321_v63 = vadd.f32 %v320_v57, %v306_v56 }
 0x120   :  { %v322_v1 = vadd.f32 %v321_v63, %v307_v62  ;;  %v3083_v2 = vpop.f32.mrb[6].mxu0  ;;  %v286_v3 = vadd.f32 %v3073_v58, %v285_v61 }
 0x121   :  { %v3086_v4 = vpop.f32.mrb[7].mxu0  ;;  %v310_v8 = vmul.f32 %v3083_v2, %v3083_v2 }
 0x122   :  { %v287_v5 = vadd.f32 %v286_v3, %v3086_v4  ;;  %v309_v6 = vmul.f32 %v3086_v4, %v3086_v4  ;;  %v323_v7 = vadd.f32 %v322_v1, %v308_v0 }
 0x124   :  { %v324_v9 = vadd.f32 %v323_v7, %v309_v6  ;;  %v3093_v10 = vpop.f32.mrb[8].mxu0  ;;  %v288_v11 = vadd.f32 %v3083_v2, %v287_v5  ;;  %v3958_v5 = vlaneseq  ;;  %v3120_v7 = vld [vmem:[%s3956_s5] sm:$0xff] }
 0x125   :  { %v3096_v12 = vpop.f32.mrb[9].mxu0  ;;  %v312_v16 = vmul.f32 %v3093_v10, %v3093_v10 }
 0x126   :  { %v289_v13 = vadd.f32 %v288_v11, %v3096_v12  ;;  %v311_v14 = vmul.f32 %v3096_v12, %v3096_v12  ;;  %v325_v15 = vadd.f32 %v324_v9, %v310_v8  ;;  %v3115_v6 = vshrl.u32 %v3958_v5, 7 }
 0x128   :  { %v326_v17 = vadd.f32 %v325_v15, %v311_v14  ;;  %v3103_v18 = vpop.f32.mrb[10].mxu0  ;;  %v290_v19 = vadd.f32 %v3093_v10, %v289_v13  ;;  %v354_v8 = vsub.s32 0, %v3115_v6  ;;  %v374_v15 = vsub.s32 5, %v3115_v6 }
 0x129   :  { %v3106_v20 = vpop.f32.mrb[11].mxu0  ;;  %v314_v24 = vmul.f32 %v3103_v18, %v3103_v18 }
 0x12a   :  { %v291_v21 = vadd.f32 %v290_v19, %v3106_v20  ;;  %v313_v22 = vmul.f32 %v3106_v20, %v3106_v20  ;;  %v327_v23 = vadd.f32 %v326_v17, %v312_v16 }
 0x12c   :  { %v328_v25 = vadd.f32 %v327_v23, %v313_v22  ;;  %v2388_v26 = vpop.f32.mrb[12].mxu0  ;;  %v292_v27 = vadd.f32 %v3103_v18, %v291_v21 }
 0x12d   :  { %v263_v28 = vpop.f32.mrb[13].mxu0  ;;  %v316_v32 = vmul.f32 %v2388_v26, %v2388_v26 }
 0x12e   :  { %v293_v29 = vadd.f32 %v292_v27, %v263_v28  ;;  %v315_v30 = vmul.f32 %v263_v28, %v263_v28  ;;  %v329_v31 = vadd.f32 %v328_v25, %v314_v24 }
 0x130   :  { %v330_v33 = vadd.f32 %v329_v31, %v315_v30  ;;  %v2391_v34 = vpop.f32.mrb[14].mxu0  ;;  %v294_v35 = vadd.f32 %v2388_v26, %v293_v29 }
 0x131   :  { %v273_v36 = vpop.f32.mrb[15].mxu0  ;;  %v318_v40 = vmul.f32 %v2391_v34, %v2391_v34 }
 0x132   :  { %v295_v37 = vadd.f32 %v294_v35, %v273_v36  ;;  %v317_v38 = vmul.f32 %v273_v36, %v273_v36  ;;  %v331_v39 = vadd.f32 %v330_v33, %v316_v32 }
 0x134   :  { %v296_v41 = vadd.f32 %v2391_v34, %v295_v37  ;;  %v332_v42 = vadd.f32 %v331_v39, %v317_v38 }
 0x136   :  { %v297_v43 = vrot.slane %v296_v41, 4  ;;  %v333_v44 = vadd.f32 %v332_v42, %v318_v40 }
 0x138   :  { %v298_v45 = vadd.f32 %v297_v43, %v296_v41  ;;  %v334_v47 = vrot.slane %v333_v44, 4 }
 0x13a   :  { %v299_v49 = vrot.slane %v298_v45, 2  ;;  %v335_v50 = vadd.f32 %v334_v47, %v333_v44 }
 0x13c   :  { %v300_v51 = vadd.f32 %v299_v49, %v298_v45  ;;  %v336_v54 = vrot.slane %v335_v50, 2 }
 0x13e   :  { %v301_v55 = vrot.slane %v300_v51, 1  ;;  %v337_v56 = vadd.f32 %v336_v54, %v335_v50 }
 0x140   :  { %v302_v57 = vadd.f32 %v301_v55, %v300_v51  ;;  %v338_v59 = vrot.slane %v337_v56, 1 }
 0x142   :  { %v339_v61 = vadd.f32 %v338_v59, %v337_v56  ;;  %v340_v62 = vmul.f32 0.0078125, %v302_v57 }
 0x144   :  { %v341_v63 = vmul.f32 0.0078125, %v339_v61  ;;  %v342_v0 = vmul.f32 %v340_v62, %v340_v62 }
 0x146   :  { %v343_v1 = vsub.f32 %v341_v63, %v342_v0  ;;  %v696_v63 = vld [vmem:[#allocation2 + $0x80] sm:$0xff]  ;;  %v697_v0 = vld [vmem:[#allocation2 + $0x88] sm:$0xff] }
 0x148   :  { %v344_v3 = vadd.f32 1e-05, %v343_v1  ;;  %v2600_v1 = vpack.c.bf16 %v697_v0, %v696_v63 }
 0x14a   :  { %2752 = vrsqrt.f32 %v344_v3  ;;  %2601 = vmatprep.subr.bf16.mxu0 %v2600_v1  ;;  %v698_v3 = vld [vmem:[#allocation2 + $0x90] sm:$0xff] }
 0x14b   :  { %2603 = vmatpush3.bf16.msra.mxu0 %v2600_v1 }
 0x154   :  { %v2753_v9 = vpop.eup %2752 }
 0x155   :  { %v346_v11 = vmul.f32 %v2753_v9, %v3120_v7  ;;  %v699_v9 = vld [vmem:[#allocation2 + $0x98] sm:$0xff] }
 0x157   :  { %v347_v13 = vmul.f32 %v346_v11, %v340_v62  ;;  %v355_v14 = vrot.slane %v346_v11, %v354_v8  ;;  %v2604_v11 = vpack.c.bf16 %v699_v9, %v698_v3 }
 0x159   :  { %v349_v16 = vrot.slane %v347_v13, 3  ;;  %v370_v17 = vmul.f32 %v355_v14, %v273_v36  ;;  %v356_v19 = vmul.f32 %v355_v14, %v3058_v48  ;;  %v357_v21 = vmul.f32 %v3054_v46, %v355_v14  ;;  %2605 = vmatprep.subr.bf16.mxu0 %v2604_v11  ;;  %v700_v13 = vld [vmem:[#allocation2 + $0xa0] sm:$0xff] }
 0x15a   :  { %v358_v22 = vmul.f32 %v355_v14, %v3066_v53  ;;  %v359_v23 = vmul.f32 %v3064_v52, %v355_v14  ;;  %v360_v24 = vmul.f32 %v355_v14, %v3076_v60  ;;  %v361_v25 = vmul.f32 %v3073_v58, %v355_v14  ;;  %2607 = vmatpush3.bf16.msra.mxu0 %v2604_v11 }
 0x15b   :  { %v351_v27 = vsub.f32 %v3120_v7, %v349_v16  ;;  %v362_v29 = vmul.f32 %v355_v14, %v3086_v4  ;;  %v363_v30 = vmul.f32 %v3083_v2, %v355_v14  ;;  %v364_v31 = vmul.f32 %v355_v14, %v3096_v12  ;;  %v702_v16 = vld [vmem:[#allocation2 + $0xb0] sm:$0xff] }
 0x15c   :  { %v365_v48 = vmul.f32 %v3093_v10, %v355_v14  ;;  %v366_v46 = vmul.f32 %v355_v14, %v3106_v20  ;;  %v367_v53 = vmul.f32 %v3103_v18, %v355_v14  ;;  %v368_v32 = vmul.f32 %v355_v14, %v263_v28 }
 0x15d   :  { %v375_v52 = vrot.slane %v351_v27, %v374_v15  ;;  %v369_v33 = vmul.f32 %v2388_v26, %v355_v14  ;;  %v371_v60 = vmul.f32 %v2391_v34, %v355_v14  ;;  %v701_v14 = vld [vmem:[#allocation2 + $0xa8] sm:$0xff] }
 0x15e   :  { %v2608_v15 = vpack.c.bf16 %v701_v14, %v700_v13 }
 0x15f   :  { %v376_v35 = vadd.f32 %v375_v52, %v356_v19  ;;  %v377_v58 = vadd.f32 %v375_v52, %v357_v21  ;;  %v378_v36 = vadd.f32 %v375_v52, %v358_v22  ;;  %v379_v37 = vadd.f32 %v375_v52, %v359_v23  ;;  %v704_v21 = vld [vmem:[#allocation2 + $0xc0] sm:$0xff]  ;;  %v705_v22 = vld [vmem:[#allocation2 + $0xc8] sm:$0xff] }
 0x160   :  { %v380_v38 = vadd.f32 %v375_v52, %v360_v24  ;;  %v381_v4 = vadd.f32 %v375_v52, %v361_v25  ;;  %v382_v39 = vadd.f32 %v375_v52, %v362_v29  ;;  %v383_v2 = vadd.f32 %v375_v52, %v363_v30  ;;  %2609 = vmatprep.subr.bf16.mxu0 %v2608_v15  ;;  %v706_v24 = vld [vmem:[#allocation2 + $0xd0] sm:$0xff]  ;;  %v707_v25 = vld [vmem:[#allocation2 + $0xd8] sm:$0xff]  ;;  %v708_v29 = vld [vmem:[#allocation2 + $0xe0] sm:$0xff] }
 0x161   :  { %v392_v40 = vmax.f32 %v376_v35, 0.0  ;;  %v393_v12 = vmax.f32 %v377_v58, 0.0  ;;  %v394_v41 = vmax.f32 %v378_v36, 0.0  ;;  %v384_v10 = vadd.f32 %v375_v52, %v364_v31  ;;  %2611 = vmatpush3.bf16.msra.mxu0 %v2608_v15  ;;  %v709_v30 = vld [vmem:[#allocation2 + $0xe8] sm:$0xff]  ;;  %v710_v31 = vld [vmem:[#allocation2 + $0xf0] sm:$0xff] }
 0x162   :  { %v385_v20 = vadd.f32 %v375_v52, %v365_v48  ;;  %v386_v42 = vadd.f32 %v375_v52, %v366_v46  ;;  %v387_v18 = vadd.f32 %v375_v52, %v367_v53  ;;  %v388_v28 = vadd.f32 %v375_v52, %v368_v32  ;;  %v711_v46 = vld [vmem:[#allocation2 + $0xf8] sm:$0xff] }
 0x163   :  { %2424 = vmatprep.mubr.f32.mxu1 %v392_v40  ;;  %v389_v26 = vadd.f32 %v375_v52, %v369_v33  ;;  %v390_v34 = vadd.f32 %v375_v52, %v370_v17  ;;  %v391_v43 = vadd.f32 %v375_v52, %v371_v60  ;;  %v395_v44 = vmax.f32 %v379_v37, 0.0  ;;  %v703_v17 = vld [vmem:[#allocation2 + $0xb8] sm:$0xff] }
 0x164   :  { %2425 = vmatmul.mubr.f32.vlgmr.msra.gmra.mrb[0].mxu1 %v393_v12  ;;  %v396_v45 = vmax.f32 %v380_v38, 0.0  ;;  %v397_v47 = vmax.f32 %v381_v4, 0.0  ;;  %v398_v49 = vmax.f32 %v382_v39, 0.0  ;;  %v399_v50 = vmax.f32 %v383_v2, 0.0 }
 0x165   :  { %2427 = vmatprep.mubr.f32.mxu1 %v394_v41  ;;  %v400_v51 = vmax.f32 %v384_v10, 0.0  ;;  %v401_v54 = vmax.f32 %v385_v20, 0.0  ;;  %v402_v55 = vmax.f32 %v386_v42, 0.0  ;;  %v403_v56 = vmax.f32 %v387_v18, 0.0 }
 0x166   :  { %v404_v57 = vmax.f32 %v388_v28, 0.0  ;;  %v405_v59 = vmax.f32 %v389_v26, 0.0  ;;  %v406_v61 = vmax.f32 %v390_v34, 0.0  ;;  %v407_v62 = vmax.f32 %v391_v43, 0.0 }
 0x167   :  { %v2612_v19 = vpack.c.bf16 %v703_v17, %v702_v16  ;;  %v2616_v23 = vpack.c.bf16 %v705_v22, %v704_v21  ;;  %v2620_v27 = vpack.c.bf16 %v707_v25, %v706_v24  ;;  %v2624_v48 = vpack.c.bf16 %v709_v30, %v708_v29 }
 0x168   :  { %2428 = vmatmul.mubr.f32.gmra.mrb[2].mxu1 %v395_v44  ;;  %v2628_v53 = vpack.c.bf16 %v711_v46, %v710_v31 }
 0x169   :  { %2430 = vmatprep.mubr.f32.mxu1 %v396_v45  ;;  %2613 = vmatprep.subr.bf16.mxu0 %v2612_v19 }
 0x16a   :  { %2615 = vmatpush3.bf16.msra.mxu0 %v2612_v19 }
 0x16b   :  { %2617 = vmatprep.subr.bf16.mxu0 %v2616_v23 }
 0x16c   :  { %2431 = vmatmul.mubr.f32.gmra.mrb[4].mxu1 %v397_v47 }
 0x16d   :  { %2433 = vmatprep.mubr.f32.mxu1 %v398_v49 }
 0x16e   :  { %2619 = vmatpush3.bf16.msra.mxu0 %v2616_v23 }
 0x16f   :  { %2621 = vmatprep.subr.bf16.mxu0 %v2620_v27 }
 0x170   :  { %2434 = vmatmul.mubr.f32.gmra.mrb[6].mxu1 %v399_v50 }
 0x171   :  { %2436 = vmatprep.mubr.f32.mxu1 %v400_v51 }
 0x172   :  { %2623 = vmatpush3.bf16.msra.mxu0 %v2620_v27 }
 0x173   :  { %2625 = vmatprep.subr.bf16.mxu0 %v2624_v48 }
 0x174   :  { %2437 = vmatmul.mubr.f32.gmra.mrb[8].mxu1 %v401_v54 }
 0x175   :  { %2439 = vmatprep.mubr.f32.mxu1 %v402_v55 }
 0x176   :  { %2627 = vmatpush3.bf16.msra.mxu0 %v2624_v48 }
 0x177   :  { %2629 = vmatprep.subr.bf16.mxu0 %v2628_v53 }
 0x178   :  { %2440 = vmatmul.mubr.f32.gmra.mrb[10].mxu1 %v403_v56 }
 0x179   :  { %2442 = vmatprep.mubr.f32.mxu1 %v404_v57 }
 0x17a   :  { %2631 = vmatpush3.bf16.msra.mxu0 %v2628_v53 }
 0x17c   :  { %2443 = vmatmul.mubr.f32.gmra.mrb[12].mxu1 %v405_v59 }
 0x17d   :  { %2445 = vmatprep.mubr.f32.mxu1 %v406_v61 }
 0x180   :  { %2446 = vmatmul.mubr.f32.gmra.mrb[14].mxu1 %v407_v62 }
 0x237   :  { %v3140_v32 = vpop.f32.mrb[0].mxu1 }
 0x238   :  { %v591_v52 = vmul.f32 %v3140_v32, %v3140_v32  ;;  %v3144_v33 = vpop.f32.mrb[1].mxu1 }
 0x239   :  { %v569_v60 = vadd.f32 %v3140_v32, %v3144_v33  ;;  %v590_v35 = vmul.f32 %v3144_v33, %v3144_v33 }
 0x23b   :  { %v606_v58 = vadd.f32 %v591_v52, %v590_v35  ;;  %v3150_v36 = vpop.f32.mrb[2].mxu1 }
 0x23c   :  { %v3152_v37 = vpop.f32.mrb[3].mxu1  ;;  %v593_v39 = vmul.f32 %v3150_v36, %v3150_v36 }
 0x23d   :  { %v570_v38 = vadd.f32 %v569_v60, %v3152_v37  ;;  %v592_v4 = vmul.f32 %v3152_v37, %v3152_v37 }
 0x23f   :  { %v607_v2 = vadd.f32 %v606_v58, %v592_v4  ;;  %v3159_v40 = vpop.f32.mrb[4].mxu1  ;;  %v571_v12 = vadd.f32 %v3150_v36, %v570_v38 }
 0x240   :  { %v3162_v41 = vpop.f32.mrb[5].mxu1  ;;  %v595_v18 = vmul.f32 %v3159_v40, %v3159_v40 }
 0x241   :  { %v572_v10 = vadd.f32 %v571_v12, %v3162_v41  ;;  %v594_v20 = vmul.f32 %v3162_v41, %v3162_v41  ;;  %v608_v42 = vadd.f32 %v607_v2, %v593_v39 }
 0x243   :  { %v609_v28 = vadd.f32 %v608_v42, %v594_v20  ;;  %v3169_v26 = vpop.f32.mrb[6].mxu1  ;;  %v573_v34 = vadd.f32 %v3159_v40, %v572_v10 }
 0x244   :  { %v3172_v43 = vpop.f32.mrb[7].mxu1  ;;  %v597_v49 = vmul.f32 %v3169_v26, %v3169_v26 }
 0x245   :  { %v574_v44 = vadd.f32 %v573_v34, %v3172_v43  ;;  %v596_v45 = vmul.f32 %v3172_v43, %v3172_v43  ;;  %v610_v47 = vadd.f32 %v609_v28, %v595_v18 }
 0x247   :  { %v611_v50 = vadd.f32 %v610_v47, %v596_v45  ;;  %v3179_v51 = vpop.f32.mrb[8].mxu1  ;;  %v575_v54 = vadd.f32 %v3169_v26, %v574_v44 }
 0x248   :  { %v3182_v55 = vpop.f32.mrb[9].mxu1  ;;  %v599_v61 = vmul.f32 %v3179_v51, %v3179_v51 }
 0x249   :  { %v576_v56 = vadd.f32 %v575_v54, %v3182_v55  ;;  %v598_v57 = vmul.f32 %v3182_v55, %v3182_v55  ;;  %v612_v59 = vadd.f32 %v611_v50, %v597_v49  ;;  %v3196_v50 = vsub.s32 1, %v3115_v6 }
 0x24b   :  { %v613_v62 = vadd.f32 %v612_v59, %v598_v57  ;;  %v3189_v63 = vpop.f32.mrb[10].mxu1  ;;  %v577_v0 = vadd.f32 %v3179_v51, %v576_v56 }
 0x24c   :  { %v540_v1 = vpop.f32.mrb[11].mxu1  ;;  %v601_v13 = vmul.f32 %v3189_v63, %v3189_v63 }
 0x24d   :  { %v578_v3 = vadd.f32 %v577_v0, %v540_v1  ;;  %v600_v9 = vmul.f32 %v540_v1, %v540_v1  ;;  %v614_v11 = vadd.f32 %v613_v62, %v599_v61  ;;  %v661_v61 = vsub.s32 6, %v3115_v6 }
 0x24f   :  { %v615_v14 = vadd.f32 %v614_v11, %v600_v9  ;;  %v2444_v15 = vpop.f32.mrb[12].mxu1  ;;  %v579_v16 = vadd.f32 %v3189_v63, %v578_v3 }
 0x250   :  { %v550_v17 = vpop.f32.mrb[13].mxu1  ;;  %v603_v23 = vmul.f32 %v2444_v15, %v2444_v15 }
 0x251   :  { %v580_v19 = vadd.f32 %v579_v16, %v550_v17  ;;  %v602_v21 = vmul.f32 %v550_v17, %v550_v17  ;;  %v616_v22 = vadd.f32 %v615_v14, %v601_v13 }
 0x253   :  { %v617_v24 = vadd.f32 %v616_v22, %v602_v21  ;;  %v2447_v25 = vpop.f32.mrb[14].mxu1  ;;  %v581_v27 = vadd.f32 %v2444_v15, %v580_v19 }
 0x254   :  { %v560_v29 = vpop.f32.mrb[15].mxu1  ;;  %v605_v46 = vmul.f32 %v2447_v25, %v2447_v25 }
 0x255   :  { %v582_v30 = vadd.f32 %v581_v27, %v560_v29  ;;  %v604_v31 = vmul.f32 %v560_v29, %v560_v29  ;;  %v618_v48 = vadd.f32 %v617_v24, %v603_v23 }
 0x257   :  { %v583_v53 = vadd.f32 %v2447_v25, %v582_v30  ;;  %v619_v52 = vadd.f32 %v618_v48, %v604_v31 }
 0x259   :  { %v584_v60 = vrot.slane %v583_v53, 4  ;;  %v620_v35 = vadd.f32 %v619_v52, %v605_v46 }
 0x25b   :  { %v585_v58 = vadd.f32 %v584_v60, %v583_v53  ;;  %v621_v38 = vrot.slane %v620_v35, 4 }
 0x25d   :  { %v586_v4 = vrot.slane %v585_v58, 2  ;;  %v622_v39 = vadd.f32 %v621_v38, %v620_v35 }
 0x25f   :  { %v587_v2 = vadd.f32 %v586_v4, %v585_v58  ;;  %v623_v12 = vrot.slane %v622_v39, 2 }
 0x261   :  { %v588_v10 = vrot.slane %v587_v2, 1  ;;  %v624_v20 = vadd.f32 %v623_v12, %v622_v39 }
 0x263   :  { %v589_v42 = vadd.f32 %v588_v10, %v587_v2  ;;  %v625_v18 = vrot.slane %v624_v20, 1 }
 0x265   :  { %v626_v28 = vadd.f32 %v625_v18, %v624_v20  ;;  %v627_v34 = vmul.f32 0.0078125, %v589_v42 }
 0x267   :  { %v628_v44 = vmul.f32 0.0078125, %v626_v28  ;;  %v629_v45 = vmul.f32 %v627_v34, %v627_v34 }
 0x269   :  { %v630_v47 = vsub.f32 %v628_v44, %v629_v45  ;;  %v984_v45 = vld [vmem:[#allocation2 + $0x100] sm:$0xff] }
 0x26b   :  { %v631_v49 = vadd.f32 1e-05, %v630_v47  ;;  %v985_v47 = vld [vmem:[#allocation2 + $0x108] sm:$0xff] }
 0x26d   :  { %2754 = vrsqrt.f32 %v631_v49  ;;  %v2632_v49 = vpack.c.bf16 %v985_v47, %v984_v45 }
 0x26f   :  { %2633 = vmatprep.subr.bf16.mxu1 %v2632_v49 }
 0x270   :  { %2635 = vmatpush3.bf16.msra.mxu1 %v2632_v49 }
 0x277   :  { %v2755_v54 = vpop.eup %2754 }
 0x278   :  { %v633_v56 = vmul.f32 %v2755_v54, %v3120_v7  ;;  %v986_v54 = vld [vmem:[#allocation2 + $0x110] sm:$0xff] }
 0x27a   :  { %v634_v57 = vmul.f32 %v633_v56, %v627_v34  ;;  %v642_v59 = vrot.slane %v633_v56, %v3196_v50  ;;  %v987_v56 = vld [vmem:[#allocation2 + $0x118] sm:$0xff] }
 0x27c   :  { %v636_v62 = vrot.slane %v634_v57, 3  ;;  %v657_v0 = vmul.f32 %v642_v59, %v560_v29  ;;  %v643_v3 = vmul.f32 %v642_v59, %v3144_v33  ;;  %v644_v9 = vmul.f32 %v3140_v32, %v642_v59 }
 0x27d   :  { %v645_v11 = vmul.f32 %v642_v59, %v3152_v37  ;;  %v646_v13 = vmul.f32 %v3150_v36, %v642_v59  ;;  %v647_v14 = vmul.f32 %v642_v59, %v3162_v41  ;;  %v648_v16 = vmul.f32 %v3159_v40, %v642_v59 }
 0x27e   :  { %v638_v19 = vsub.f32 %v3120_v7, %v636_v62  ;;  %v649_v21 = vmul.f32 %v642_v59, %v3172_v43  ;;  %v650_v22 = vmul.f32 %v3169_v26, %v642_v59  ;;  %v651_v23 = vmul.f32 %v642_v59, %v3182_v55 }
 0x27f   :  { %v652_v33 = vmul.f32 %v3179_v51, %v642_v59  ;;  %v653_v24 = vmul.f32 %v642_v59, %v540_v1  ;;  %v654_v32 = vmul.f32 %v3189_v63, %v642_v59  ;;  %v655_v37 = vmul.f32 %v642_v59, %v550_v17 }
 0x280   :  { %v662_v27 = vrot.slane %v638_v19, %v661_v61  ;;  %v656_v36 = vmul.f32 %v2444_v15, %v642_v59  ;;  %v658_v29 = vmul.f32 %v2447_v25, %v642_v59  ;;  %v2636_v57 = vpack.c.bf16 %v987_v56, %v986_v54  ;;  %v988_v59 = vld [vmem:[#allocation2 + $0x120] sm:$0xff]  ;;  %v989_v61 = vld [vmem:[#allocation2 + $0x128] sm:$0xff]  ;;  %v995_v19 = vld [vmem:[#allocation2 + $0x158] sm:$0xff] }
 0x281   :  { %v2640_v62 = vpack.c.bf16 %v989_v61, %v988_v59 }
 0x282   :  { %v663_v41 = vadd.f32 %v662_v27, %v643_v3  ;;  %v664_v30 = vadd.f32 %v662_v27, %v644_v9  ;;  %v665_v40 = vadd.f32 %v662_v27, %v645_v11  ;;  %v666_v31 = vadd.f32 %v662_v27, %v646_v13  ;;  %2637 = vmatprep.subr.bf16.mxu1 %v2636_v57  ;;  %v991_v3 = vld [vmem:[#allocation2 + $0x138] sm:$0xff]  ;;  %v992_v11 = vld [vmem:[#allocation2 + $0x140] sm:$0xff]  ;;  %v993_v13 = vld [vmem:[#allocation2 + $0x148] sm:$0xff] }
 0x283   :  { %v667_v48 = vadd.f32 %v662_v27, %v647_v14  ;;  %v668_v46 = vadd.f32 %v662_v27, %v648_v16  ;;  %v669_v43 = vadd.f32 %v662_v27, %v649_v21  ;;  %v670_v53 = vadd.f32 %v662_v27, %v650_v22  ;;  %2639 = vmatpush3.bf16.msra.mxu1 %v2636_v57  ;;  %v994_v16 = vld [vmem:[#allocation2 + $0x150] sm:$0xff]  ;;  %v996_v22 = vld [vmem:[#allocation2 + $0x160] sm:$0xff] }
 0x284   :  { %v679_v26 = vmax.f32 %v663_v41, 0.0  ;;  %v680_v52 = vmax.f32 %v664_v30, 0.0  ;;  %v681_v55 = vmax.f32 %v665_v40, 0.0  ;;  %v671_v51 = vadd.f32 %v662_v27, %v651_v23  ;;  %2641 = vmatprep.subr.bf16.mxu1 %v2640_v62  ;;  %v997_v23 = vld [vmem:[#allocation2 + $0x168] sm:$0xff] }
 0x285   :  { %v672_v1 = vadd.f32 %v662_v27, %v652_v33  ;;  %v673_v60 = vadd.f32 %v662_v27, %v653_v24  ;;  %v674_v63 = vadd.f32 %v662_v27, %v654_v32  ;;  %v675_v17 = vadd.f32 %v662_v27, %v655_v37  ;;  %v998_v33 = vld [vmem:[#allocation2 + $0x170] sm:$0xff]  ;;  %v999_v32 = vld [vmem:[#allocation2 + $0x178] sm:$0xff] }
 0x286   :  { %2480 = vmatprep.mubr.f32.mxu0 %v679_v26  ;;  %v676_v15 = vadd.f32 %v662_v27, %v656_v36  ;;  %v677_v25 = vadd.f32 %v662_v27, %v657_v0  ;;  %v678_v35 = vadd.f32 %v662_v27, %v658_v29  ;;  %v682_v58 = vmax.f32 %v666_v31, 0.0  ;;  %v990_v0 = vld [vmem:[#allocation2 + $0x130] sm:$0xff] }
 0x287   :  { %2481 = vmatmul.mubr.f32.vlgmr.msra.gmra.mrb[16].mxu0 %v680_v52  ;;  %v683_v38 = vmax.f32 %v667_v48, 0.0  ;;  %v684_v4 = vmax.f32 %v668_v46, 0.0  ;;  %v685_v39 = vmax.f32 %v669_v43, 0.0  ;;  %v686_v2 = vmax.f32 %v670_v53, 0.0  ;;  %2643 = vmatpush3.bf16.msra.mxu1 %v2640_v62 }
 0x288   :  { %2483 = vmatprep.mubr.f32.mxu0 %v681_v55  ;;  %v687_v12 = vmax.f32 %v671_v51, 0.0  ;;  %v688_v10 = vmax.f32 %v672_v1, 0.0  ;;  %v689_v20 = vmax.f32 %v673_v60, 0.0  ;;  %v690_v42 = vmax.f32 %v674_v63, 0.0 }
 0x289   :  { %v691_v18 = vmax.f32 %v675_v17, 0.0  ;;  %v692_v28 = vmax.f32 %v676_v15, 0.0  ;;  %v693_v34 = vmax.f32 %v677_v25, 0.0  ;;  %v694_v44 = vmax.f32 %v678_v35, 0.0 }
 0x28a   :  { %v2644_v9 = vpack.c.bf16 %v991_v3, %v990_v0  ;;  %v2648_v14 = vpack.c.bf16 %v993_v13, %v992_v11  ;;  %v2652_v21 = vpack.c.bf16 %v995_v19, %v994_v16  ;;  %v2656_v24 = vpack.c.bf16 %v997_v23, %v996_v22 }
 0x28b   :  { %2484 = vmatmul.mubr.f32.gmra.mrb[18].mxu0 %v682_v58  ;;  %v2660_v37 = vpack.c.bf16 %v999_v32, %v998_v33 }
 0x28c   :  { %2486 = vmatprep.mubr.f32.mxu0 %v683_v38  ;;  %2645 = vmatprep.subr.bf16.mxu1 %v2644_v9 }
 0x28d   :  { %2647 = vmatpush3.bf16.msra.mxu1 %v2644_v9 }
 0x28e   :  { %2649 = vmatprep.subr.bf16.mxu1 %v2648_v14 }
 0x28f   :  { %2487 = vmatmul.mubr.f32.gmra.mrb[20].mxu0 %v684_v4 }
 0x290   :  { %2489 = vmatprep.mubr.f32.mxu0 %v685_v39 }
 0x291   :  { %2651 = vmatpush3.bf16.msra.mxu1 %v2648_v14 }
 0x292   :  { %2653 = vmatprep.subr.bf16.mxu1 %v2652_v21 }
 0x293   :  { %2490 = vmatmul.mubr.f32.gmra.mrb[22].mxu0 %v686_v2 }
 0x294   :  { %2492 = vmatprep.mubr.f32.mxu0 %v687_v12 }
 0x295   :  { %2655 = vmatpush3.bf16.msra.mxu1 %v2652_v21 }
 0x296   :  { %2657 = vmatprep.subr.bf16.mxu1 %v2656_v24 }
 0x297   :  { %2493 = vmatmul.mubr.f32.gmra.mrb[24].mxu0 %v688_v10 }
 0x298   :  { %2495 = vmatprep.mubr.f32.mxu0 %v689_v20 }
 0x299   :  { %2659 = vmatpush3.bf16.msra.mxu1 %v2656_v24 }
 0x29a   :  { %2661 = vmatprep.subr.bf16.mxu1 %v2660_v37 }
 0x29b   :  { %2496 = vmatmul.mubr.f32.gmra.mrb[26].mxu0 %v690_v42 }
 0x29c   :  { %2498 = vmatprep.mubr.f32.mxu0 %v691_v18 }
 0x29d   :  { %2663 = vmatpush3.bf16.msra.mxu1 %v2660_v37 }
 0x29f   :  { %2499 = vmatmul.mubr.f32.gmra.mrb[28].mxu0 %v692_v28 }
 0x2a0   :  { %2501 = vmatprep.mubr.f32.mxu0 %v693_v34 }
 0x2a3   :  { %2502 = vmatmul.mubr.f32.gmra.mrb[30].mxu0 %v694_v44 }
 0x35a   :  { %v3213_v27 = vpop.f32.mrb[16].mxu0 }
 0x35b   :  { %v879_v36 = vmul.f32 %v3213_v27, %v3213_v27  ;;  %v3217_v29 = vpop.f32.mrb[17].mxu0 }
 0x35c   :  { %v857_v41 = vadd.f32 %v3213_v27, %v3217_v29  ;;  %v878_v30 = vmul.f32 %v3217_v29, %v3217_v29 }
 0x35e   :  { %v894_v40 = vadd.f32 %v879_v36, %v878_v30  ;;  %v3223_v31 = vpop.f32.mrb[18].mxu0 }
 0x35f   :  { %v3225_v48 = vpop.f32.mrb[19].mxu0  ;;  %v881_v53 = vmul.f32 %v3223_v31, %v3223_v31 }
 0x360   :  { %v858_v46 = vadd.f32 %v857_v41, %v3225_v48  ;;  %v880_v43 = vmul.f32 %v3225_v48, %v3225_v48 }
 0x362   :  { %v895_v26 = vadd.f32 %v894_v40, %v880_v43  ;;  %v3232_v52 = vpop.f32.mrb[20].mxu0  ;;  %v859_v55 = vadd.f32 %v3223_v31, %v858_v46 }
 0x363   :  { %v3235_v51 = vpop.f32.mrb[21].mxu0  ;;  %v883_v17 = vmul.f32 %v3232_v52, %v3232_v52 }
 0x364   :  { %v860_v1 = vadd.f32 %v859_v55, %v3235_v51  ;;  %v882_v60 = vmul.f32 %v3235_v51, %v3235_v51  ;;  %v896_v63 = vadd.f32 %v895_v26, %v881_v53 }
 0x366   :  { %v897_v15 = vadd.f32 %v896_v63, %v882_v60  ;;  %v3242_v25 = vpop.f32.mrb[22].mxu0  ;;  %v861_v35 = vadd.f32 %v3232_v52, %v860_v1 }
 0x367   :  { %v3245_v58 = vpop.f32.mrb[23].mxu0  ;;  %v885_v2 = vmul.f32 %v3242_v25, %v3242_v25 }
 0x368   :  { %v862_v38 = vadd.f32 %v861_v35, %v3245_v58  ;;  %v884_v4 = vmul.f32 %v3245_v58, %v3245_v58  ;;  %v898_v39 = vadd.f32 %v897_v15, %v883_v17 }
 0x36a   :  { %v899_v12 = vadd.f32 %v898_v39, %v884_v4  ;;  %v3252_v10 = vpop.f32.mrb[24].mxu0  ;;  %v863_v20 = vadd.f32 %v3242_v25, %v862_v38 }
 0x36b   :  { %v3255_v42 = vpop.f32.mrb[25].mxu0  ;;  %v887_v44 = vmul.f32 %v3252_v10, %v3252_v10 }
 0x36c   :  { %v864_v18 = vadd.f32 %v863_v20, %v3255_v42  ;;  %v886_v28 = vmul.f32 %v3255_v42, %v3255_v42  ;;  %v900_v34 = vadd.f32 %v899_v12, %v885_v2  ;;  %v929_v20 = vsub.s32 2, %v3115_v6 }
 0x36e   :  { %v901_v45 = vadd.f32 %v900_v34, %v886_v28  ;;  %v3262_v47 = vpop.f32.mrb[26].mxu0  ;;  %v865_v49 = vadd.f32 %v3252_v10, %v864_v18 }
 0x36f   :  { %v828_v54 = vpop.f32.mrb[27].mxu0  ;;  %v889_v61 = vmul.f32 %v3262_v47, %v3262_v47 }
 0x370   :  { %v866_v56 = vadd.f32 %v865_v49, %v828_v54  ;;  %v888_v57 = vmul.f32 %v828_v54, %v828_v54  ;;  %v902_v59 = vadd.f32 %v901_v45, %v887_v44  ;;  %v949_v45 = vsub.s32 7, %v3115_v6 }
 0x372   :  { %v903_v62 = vadd.f32 %v902_v59, %v888_v57  ;;  %v2500_v0 = vpop.f32.mrb[28].mxu0  ;;  %v867_v3 = vadd.f32 %v3262_v47, %v866_v56 }
 0x373   :  { %v838_v9 = vpop.f32.mrb[29].mxu0  ;;  %v891_v16 = vmul.f32 %v2500_v0, %v2500_v0 }
 0x374   :  { %v868_v11 = vadd.f32 %v867_v3, %v838_v9  ;;  %v890_v13 = vmul.f32 %v838_v9, %v838_v9  ;;  %v904_v14 = vadd.f32 %v903_v62, %v889_v61 }
 0x376   :  { %v905_v19 = vadd.f32 %v904_v14, %v890_v13  ;;  %v2503_v21 = vpop.f32.mrb[30].mxu0  ;;  %v869_v22 = vadd.f32 %v2500_v0, %v868_v11 }
 0x377   :  { %v848_v23 = vpop.f32.mrb[31].mxu0  ;;  %v893_v37 = vmul.f32 %v2503_v21, %v2503_v21 }
 0x378   :  { %v870_v33 = vadd.f32 %v869_v22, %v848_v23  ;;  %v892_v24 = vmul.f32 %v848_v23, %v848_v23  ;;  %v906_v32 = vadd.f32 %v905_v19, %v891_v16 }
 0x37a   :  { %v871_v36 = vadd.f32 %v2503_v21, %v870_v33  ;;  %v907_v41 = vadd.f32 %v906_v32, %v892_v24 }
 0x37c   :  { %v872_v30 = vrot.slane %v871_v36, 4  ;;  %v908_v40 = vadd.f32 %v907_v41, %v893_v37 }
 0x37e   :  { %v873_v46 = vadd.f32 %v872_v30, %v871_v36  ;;  %v909_v43 = vrot.slane %v908_v40, 4 }
 0x380   :  { %v874_v53 = vrot.slane %v873_v46, 2  ;;  %v910_v26 = vadd.f32 %v909_v43, %v908_v40 }
 0x382   :  { %v875_v55 = vadd.f32 %v874_v53, %v873_v46  ;;  %v911_v1 = vrot.slane %v910_v26, 2 }
 0x384   :  { %v876_v60 = vrot.slane %v875_v55, 1  ;;  %v912_v63 = vadd.f32 %v911_v1, %v910_v26 }
 0x386   :  { %v877_v17 = vadd.f32 %v876_v60, %v875_v55  ;;  %v913_v15 = vrot.slane %v912_v63, 1 }
 0x388   :  { %v914_v35 = vadd.f32 %v913_v15, %v912_v63  ;;  %v915_v38 = vmul.f32 0.0078125, %v877_v17 }
 0x38a   :  { %v916_v4 = vmul.f32 0.0078125, %v914_v35  ;;  %v917_v39 = vmul.f32 %v915_v38, %v915_v38 }
 0x38c   :  { %v918_v2 = vsub.f32 %v916_v4, %v917_v39  ;;  %v1272_v39 = vld [vmem:[#allocation4 + $0x8] sm:$0xff] }
 0x38e   :  { %v919_v12 = vadd.f32 1e-05, %v918_v2  ;;  %v1274_v2 = vld [vmem:[#allocation4 + $0x18] sm:$0xff] }
 0x390   :  { %2756 = vrsqrt.f32 %v919_v12  ;;  %v2664_v12 = vpack.c.bf16 %v1274_v2, %v1272_v39 }
 0x392   :  { %2665 = vmatprep.subr.bf16.mxu0 %v2664_v12 }
 0x39a   :  { %v2757_v18 = vpop.eup %2756 }
 0x39b   :  { %v921_v28 = vmul.f32 %v2757_v18, %v3120_v7  ;;  %v1271_v18 = vld [vmem:[#allocation4] sm:$0xff] }
 0x39d   :  { %v922_v34 = vmul.f32 %v921_v28, %v915_v38  ;;  %v930_v44 = vrot.slane %v921_v28, %v929_v20  ;;  %v1273_v28 = vld [vmem:[#allocation4 + $0x10] sm:$0xff] }
 0x39f   :  { %v924_v49 = vrot.slane %v922_v34, 3  ;;  %v945_v56 = vmul.f32 %v930_v44, %v848_v23  ;;  %v931_v57 = vmul.f32 %v930_v44, %v3217_v29  ;;  %v932_v59 = vmul.f32 %v3213_v27, %v930_v44 }
 0x3a0   :  { %v933_v61 = vmul.f32 %v930_v44, %v3225_v48  ;;  %v934_v62 = vmul.f32 %v3223_v31, %v930_v44  ;;  %v935_v3 = vmul.f32 %v930_v44, %v3235_v51  ;;  %v936_v11 = vmul.f32 %v3232_v52, %v930_v44 }
 0x3a1   :  { %v926_v13 = vsub.f32 %v3120_v7, %v924_v49  ;;  %v937_v14 = vmul.f32 %v930_v44, %v3245_v58  ;;  %v938_v16 = vmul.f32 %v3242_v25, %v930_v44  ;;  %v939_v19 = vmul.f32 %v930_v44, %v3255_v42 }
 0x3a2   :  { %v940_v29 = vmul.f32 %v3252_v10, %v930_v44  ;;  %v941_v22 = vmul.f32 %v930_v44, %v828_v54  ;;  %v942_v27 = vmul.f32 %v3262_v47, %v930_v44  ;;  %v943_v48 = vmul.f32 %v930_v44, %v838_v9 }
 0x3a3   :  { %v950_v23 = vrot.slane %v926_v13, %v949_v45  ;;  %v944_v31 = vmul.f32 %v2500_v0, %v930_v44  ;;  %v946_v33 = vmul.f32 %v2503_v21, %v930_v44  ;;  %v2666_v34 = vpack.c.bf16 %v1273_v28, %v1271_v18  ;;  %v1276_v44 = vld [vmem:[#allocation4 + $0x28] sm:$0xff]  ;;  %v1278_v45 = vld [vmem:[#allocation4 + $0x38] sm:$0xff]  ;;  %v1281_v13 = vld [vmem:[#allocation4 + $0x50] sm:$0xff] }
 0x3a4   :  { %v2668_v49 = vpack.c.bf16 %v1278_v45, %v1276_v44 }
 0x3a5   :  { %v951_v51 = vadd.f32 %v950_v23, %v931_v57  ;;  %v952_v24 = vadd.f32 %v950_v23, %v932_v59  ;;  %v953_v52 = vadd.f32 %v950_v23, %v933_v61  ;;  %v954_v32 = vadd.f32 %v950_v23, %v934_v62  ;;  %2667 = vmatpush1.bf16.msra.mxu0 %v2666_v34  ;;  %v1277_v57 = vld [vmem:[#allocation4 + $0x30] sm:$0xff]  ;;  %v1280_v61 = vld [vmem:[#allocation4 + $0x48] sm:$0xff]  ;;  %v1282_v62 = vld [vmem:[#allocation4 + $0x58] sm:$0xff] }
 0x3a6   :  { %v955_v7 = vadd.f32 %v950_v23, %v935_v3  ;;  %v956_v37 = vadd.f32 %v950_v23, %v936_v11  ;;  %v957_v58 = vadd.f32 %v950_v23, %v937_v14  ;;  %v958_v36 = vadd.f32 %v950_v23, %v938_v16  ;;  %2669 = vmatprep.subr.bf16.mxu0 %v2668_v49  ;;  %v1279_v11 = vld [vmem:[#allocation4 + $0x40] sm:$0xff]  ;;  %v1284_v16 = vld [vmem:[#allocation4 + $0x68] sm:$0xff] }
 0x3a7   :  { %v967_v25 = vmax.f32 %v951_v51, 0.0  ;;  %v968_v41 = vmax.f32 %v952_v24, 0.0  ;;  %v969_v42 = vmax.f32 %v953_v52, 0.0  ;;  %v959_v10 = vadd.f32 %v950_v23, %v939_v19  ;;  %v1286_v19 = vld [vmem:[#allocation4 + $0x78] sm:$0xff]  ;;  %v1287_v51 = vld [vmem:[#allocation4 + $0x80] sm:$0xff]  ;;  %v1289_v24 = vld [vmem:[#allocation4 + $0x90] sm:$0xff] }
 0x3a8   :  { %v960_v54 = vadd.f32 %v950_v23, %v940_v29  ;;  %v961_v30 = vadd.f32 %v950_v23, %v941_v22  ;;  %v962_v47 = vadd.f32 %v950_v23, %v942_v27  ;;  %v963_v9 = vadd.f32 %v950_v23, %v943_v48  ;;  %v1283_v22 = vld [vmem:[#allocation4 + $0x60] sm:$0xff]  ;;  %v1285_v27 = vld [vmem:[#allocation4 + $0x70] sm:$0xff] }
 0x3a9   :  { %2536 = vmatprep.mubr.f32.mxu1 %v967_v25  ;;  %v964_v0 = vadd.f32 %v950_v23, %v944_v31  ;;  %v965_v21 = vadd.f32 %v950_v23, %v945_v56  ;;  %v966_v40 = vadd.f32 %v950_v23, %v946_v33  ;;  %v970_v46 = vmax.f32 %v954_v32, 0.0  ;;  %v1275_v56 = vld [vmem:[#allocation4 + $0x20] sm:$0xff]  ;;  %v1288_v23 = vld [vmem:[#allocation4 + $0x88] sm:$0xff]  ;;  %v1290_v31 = vld [vmem:[#allocation4 + $0x98] sm:$0xff] }
 0x3aa   :  { %2537 = vmatmul.mubr.f32.vlgmr.msra.gmra.mrb[16].mxu1 %v968_v41  ;;  %v971_v43 = vmax.f32 %v955_v7, 0.0  ;;  %v972_v53 = vmax.f32 %v956_v37, 0.0  ;;  %v973_v26 = vmax.f32 %v957_v58, 0.0  ;;  %v974_v55 = vmax.f32 %v958_v36, 0.0  ;;  %v1292_v32 = vld [vmem:[#allocation4 + $0xa8] sm:$0xff]  ;;  %v1294_v7 = vld [vmem:[#allocation4 + $0xb8] sm:$0xff] }
 0x3ab   :  { %2539 = vmatprep.mubr.f32.mxu1 %v969_v42  ;;  %v975_v1 = vmax.f32 %v959_v10, 0.0  ;;  %v976_v60 = vmax.f32 %v960_v54, 0.0  ;;  %v977_v63 = vmax.f32 %v961_v30, 0.0  ;;  %v978_v17 = vmax.f32 %v962_v47, 0.0  ;;  %v1291_v58 = vld [vmem:[#allocation4 + $0xa0] sm:$0xff]  ;;  %v1293_v36 = vld [vmem:[#allocation4 + $0xb0] sm:$0xff] }
 0x3ac   :  { %v979_v15 = vmax.f32 %v963_v9, 0.0  ;;  %v980_v35 = vmax.f32 %v964_v0, 0.0  ;;  %v981_v38 = vmax.f32 %v965_v21, 0.0  ;;  %v982_v4 = vmax.f32 %v966_v40, 0.0  ;;  %v1296_v41 = vld [vmem:[#allocation4 + $0xc8] sm:$0xff]  ;;  %v1298_v42 = vld [vmem:[#allocation4 + $0xd8] sm:$0xff] }
 0x3ad   :  { %v2670_v59 = vpack.c.bf16 %v1277_v57, %v1275_v56  ;;  %v2672_v3 = vpack.c.bf16 %v1282_v62, %v1280_v61  ;;  %v2674_v14 = vpack.c.bf16 %v1281_v13, %v1279_v11  ;;  %v2676_v29 = vpack.c.bf16 %v1286_v19, %v1284_v16  ;;  %v1295_v10 = vld [vmem:[#allocation4 + $0xc0] sm:$0xff]  ;;  %v1297_v30 = vld [vmem:[#allocation4 + $0xd0] sm:$0xff]  ;;  %v1300_v47 = vld [vmem:[#allocation4 + $0xe8] sm:$0xff] }
 0x3ae   :  { %2540 = vmatmul.mubr.f32.gmra.mrb[18].mxu1 %v970_v46  ;;  %v2678_v48 = vpack.c.bf16 %v1285_v27, %v1283_v22  ;;  %v2680_v33 = vpack.c.bf16 %v1290_v31, %v1288_v23  ;;  %v2682_v52 = vpack.c.bf16 %v1289_v24, %v1287_v51  ;;  %v2684_v37 = vpack.c.bf16 %v1294_v7, %v1292_v32  ;;  %v1302_v9 = vld [vmem:[#allocation4 + $0xf8] sm:$0xff]  ;;  %v1299_v46 = vld [vmem:[#allocation4 + $0xe0] sm:$0xff] }
 0x3af   :  { %2542 = vmatprep.mubr.f32.mxu1 %v971_v43  ;;  %2671 = vmatpush1.bf16.msra.mxu0 %v2670_v59  ;;  %v2686_v25 = vpack.c.bf16 %v1293_v36, %v1291_v58  ;;  %v2688_v54 = vpack.c.bf16 %v1298_v42, %v1296_v41  ;;  %v2906_v0 = vmov 0.0   ;;  %v2690_v21 = vpack.c.bf16 %v1297_v30, %v1295_v10  ;;  %v1301_v43 = vld [vmem:[#allocation4 + $0xf0] sm:$0xff] }
 0x3b0   :  { %2673 = vmatprep.subr.bf16.mxu0 %v2672_v3  ;;  %1367 = vmatprep.mubr.f32.mxu0 %v2906_v0  ;;  %v2692_v40 = vpack.c.bf16 %v1302_v9, %v1300_v47 }
 0x3b2   :  { %2543 = vmatmul.mubr.f32.gmra.mrb[20].mxu1 %v972_v53  ;;  %v2694_v53 = vpack.c.bf16 %v1301_v43, %v1299_v46 }
 0x3b3   :  { %2545 = vmatprep.mubr.f32.mxu1 %v973_v26  ;;  %2675 = vmatpush1.bf16.msra.mxu0 %v2674_v14 }
 0x3b4   :  { %2677 = vmatprep.subr.bf16.mxu0 %v2676_v29 }
 0x3b6   :  { %2546 = vmatmul.mubr.f32.gmra.mrb[22].mxu1 %v974_v55 }
 0x3b7   :  { %2548 = vmatprep.mubr.f32.mxu1 %v975_v1  ;;  %2679 = vmatpush1.bf16.msra.mxu0 %v2678_v48 }
 0x3b8   :  { %2681 = vmatprep.subr.bf16.mxu0 %v2680_v33 }
 0x3ba   :  { %2549 = vmatmul.mubr.f32.gmra.mrb[24].mxu1 %v976_v60 }
 0x3bb   :  { %2551 = vmatprep.mubr.f32.mxu1 %v977_v63  ;;  %2683 = vmatpush1.bf16.msra.mxu0 %v2682_v52 }
 0x3bc   :  { %2685 = vmatprep.subr.bf16.mxu0 %v2684_v37 }
 0x3be   :  { %2552 = vmatmul.mubr.f32.gmra.mrb[26].mxu1 %v978_v17 }
 0x3bf   :  { %2554 = vmatprep.mubr.f32.mxu1 %v979_v15  ;;  %2687 = vmatpush1.bf16.msra.mxu0 %v2686_v25 }
 0x3c0   :  { %2689 = vmatprep.subr.bf16.mxu0 %v2688_v54 }
 0x3c2   :  { %2555 = vmatmul.mubr.f32.gmra.mrb[28].mxu1 %v980_v35 }
 0x3c3   :  { %2557 = vmatprep.mubr.f32.mxu1 %v981_v38  ;;  %2691 = vmatpush1.bf16.msra.mxu0 %v2690_v21 }
 0x3c4   :  { %2693 = vmatprep.subr.bf16.mxu0 %v2692_v40 }
 0x3c6   :  { %2558 = vmatmul.mubr.f32.gmra.mrb[30].mxu1 %v982_v4 }
 0x3c7   :  { %2695 = vmatpush1.bf16.msra.mxu0 %v2694_v53 }
 0x47d   :  { %v3286_v26 = vpop.f32.mrb[16].mxu1 }
 0x47e   :  { %v1167_v55 = vmul.f32 %v3286_v26, %v3286_v26  ;;  %v3290_v1 = vpop.f32.mrb[17].mxu1 }
 0x47f   :  { %v1145_v60 = vadd.f32 %v3286_v26, %v3290_v1  ;;  %v1166_v63 = vmul.f32 %v3290_v1, %v3290_v1 }
 0x481   :  { %v1182_v17 = vadd.f32 %v1167_v55, %v1166_v63  ;;  %v3296_v15 = vpop.f32.mrb[18].mxu1 }
 0x482   :  { %v3298_v35 = vpop.f32.mrb[19].mxu1  ;;  %v1169_v39 = vmul.f32 %v3296_v15, %v3296_v15 }
 0x483   :  { %v1146_v38 = vadd.f32 %v1145_v60, %v3298_v35  ;;  %v1168_v4 = vmul.f32 %v3298_v35, %v3298_v35 }
 0x485   :  { %v1183_v2 = vadd.f32 %v1182_v17, %v1168_v4  ;;  %v3305_v12 = vpop.f32.mrb[20].mxu1  ;;  %v1147_v18 = vadd.f32 %v3296_v15, %v1146_v38 }
 0x486   :  { %v3308_v28 = vpop.f32.mrb[21].mxu1  ;;  %v1171_v49 = vmul.f32 %v3305_v12, %v3305_v12 }
 0x487   :  { %v1148_v34 = vadd.f32 %v1147_v18, %v3308_v28  ;;  %v1170_v44 = vmul.f32 %v3308_v28, %v3308_v28  ;;  %v1184_v45 = vadd.f32 %v1183_v2, %v1169_v39 }
 0x489   :  { %v1185_v56 = vadd.f32 %v1184_v45, %v1170_v44  ;;  %v3315_v57 = vpop.f32.mrb[22].mxu1  ;;  %v1149_v59 = vadd.f32 %v3305_v12, %v1148_v34 }
 0x48a   :  { %v3318_v61 = vpop.f32.mrb[23].mxu1  ;;  %v1173_v13 = vmul.f32 %v3315_v57, %v3315_v57 }
 0x48b   :  { %v1150_v62 = vadd.f32 %v1149_v59, %v3318_v61  ;;  %v1172_v3 = vmul.f32 %v3318_v61, %v3318_v61  ;;  %v1186_v11 = vadd.f32 %v1185_v56, %v1171_v49 }
 0x48d   :  { %v1187_v14 = vadd.f32 %v1186_v11, %v1172_v3  ;;  %v3325_v16 = vpop.f32.mrb[24].mxu1  ;;  %v1151_v19 = vadd.f32 %v3315_v57, %v1150_v62 }
 0x48e   :  { %v3328_v29 = vpop.f32.mrb[25].mxu1  ;;  %v1175_v23 = vmul.f32 %v3325_v16, %v3325_v16 }
 0x48f   :  { %v1152_v22 = vadd.f32 %v1151_v19, %v3328_v29  ;;  %v1174_v27 = vmul.f32 %v3328_v29, %v3328_v29  ;;  %v1188_v48 = vadd.f32 %v1187_v14, %v1173_v13 }
 0x491   :  { %v1189_v31 = vadd.f32 %v1188_v48, %v1174_v27  ;;  %v3335_v33 = vpop.f32.mrb[26].mxu1  ;;  %v1153_v51 = vadd.f32 %v3325_v16, %v1152_v22  ;;  %v1217_v22 = vsub.s32 3, %v3115_v6  ;;  %v3345_v48 = vld [vmem:[%s3956_s5] sm:$0xff] }
 0x492   :  { %v1116_v24 = vpop.f32.mrb[27].mxu1  ;;  %v1177_v37 = vmul.f32 %v3335_v33, %v3335_v33 }
 0x493   :  { %v1154_v52 = vadd.f32 %v1153_v51, %v1116_v24  ;;  %v1176_v32 = vmul.f32 %v1116_v24, %v1116_v24  ;;  %v1190_v7 = vadd.f32 %v1189_v31, %v1175_v23 }
 0x495   :  { %v1191_v58 = vadd.f32 %v1190_v7, %v1176_v32  ;;  %v2556_v36 = vpop.f32.mrb[28].mxu1  ;;  %v1155_v25 = vadd.f32 %v3335_v33, %v1154_v52  ;;  %v3351_v52 = vld [vmem:[%s3956_s5 + $0x10] sm:$0x7] }
 0x496   :  { %v1126_v41 = vpop.f32.mrb[29].mxu1  ;;  %v1179_v30 = vmul.f32 %v2556_v36, %v2556_v36 }
 0x497   :  { %v1156_v42 = vadd.f32 %v1155_v25, %v1126_v41  ;;  %v1178_v10 = vmul.f32 %v1126_v41, %v1126_v41  ;;  %v1192_v54 = vadd.f32 %v1191_v58, %v1177_v37 }
 0x499   :  { %v1193_v47 = vadd.f32 %v1192_v54, %v1178_v10  ;;  %v2559_v9 = vpop.f32.mrb[30].mxu1  ;;  %v1157_v21 = vadd.f32 %v2556_v36, %v1156_v42 }
 0x49a   :  { %v1136_v40 = vpop.f32.mrb[31].mxu1  ;;  %v1181_v55 = vmul.f32 %v2559_v9, %v2559_v9 }
 0x49b   :  { %v1158_v46 = vadd.f32 %v1157_v21, %v1136_v40  ;;  %v1180_v43 = vmul.f32 %v1136_v40, %v1136_v40  ;;  %v1194_v53 = vadd.f32 %v1193_v47, %v1179_v30 }
 0x49d   :  { %v1159_v60 = vadd.f32 %v2559_v9, %v1158_v46  ;;  %v1195_v63 = vadd.f32 %v1194_v53, %v1180_v43 }
 0x49f   :  { %v1160_v17 = vrot.slane %v1159_v60, 4  ;;  %v1196_v38 = vadd.f32 %v1195_v63, %v1181_v55 }
 0x4a1   :  { %v1161_v4 = vadd.f32 %v1160_v17, %v1159_v60  ;;  %v1197_v39 = vrot.slane %v1196_v38, 4 }
 0x4a3   :  { %v1162_v2 = vrot.slane %v1161_v4, 2  ;;  %v1198_v18 = vadd.f32 %v1197_v39, %v1196_v38 }
 0x4a5   :  { %v1163_v34 = vadd.f32 %v1162_v2, %v1161_v4  ;;  %v1199_v44 = vrot.slane %v1198_v18, 2 }
 0x4a7   :  { %v1164_v45 = vrot.slane %v1163_v34, 1  ;;  %v1200_v49 = vadd.f32 %v1199_v44, %v1198_v18 }
 0x4a9   :  { %v1165_v56 = vadd.f32 %v1164_v45, %v1163_v34  ;;  %v1201_v59 = vrot.slane %v1200_v49, 1 }
 0x4ab   :  { %v1202_v62 = vadd.f32 %v1201_v59, %v1200_v49  ;;  %v1203_v3 = vmul.f32 0.0078125, %v1165_v56 }
 0x4ad   :  { %v1204_v11 = vmul.f32 0.0078125, %v1202_v62  ;;  %v1205_v13 = vmul.f32 %v1203_v3, %v1203_v3 }
 0x4af   :  { %v1206_v14 = vsub.f32 %v1204_v11, %v1205_v13 }
 0x4b1   :  { %v1207_v19 = vadd.f32 1e-05, %v1206_v14 }
 0x4b3   :  { %2758 = vrsqrt.f32 %v1207_v19  ;;  %v1732_v19 = vld [vmem:[#allocation6 + $0x80] sm:$0xff] }
 0x4bd   :  { %v2759_v27 = vpop.eup %2758 }
 0x4be   :  { %v1209_v23 = vmul.f32 %v3345_v48, %v2759_v27 }
 0x4c0   :  { %v1210_v31 = vmul.f32 %v1209_v23, %v1203_v3  ;;  %v1218_v51 = vrot.slane %v1209_v23, %v1217_v22  ;;  %v1733_v22 = vld [vmem:[#allocation6 + $0x88] sm:$0xff]  ;;  %v1716_v23 = vld [vmem:[#allocation6] sm:$0xff] }
 0x4c1   :  { %v2696_v27 = vpack.c.bf16 %v1733_v22, %v1732_v19 }
 0x4c2   :  { %v1212_v32 = vrot.slane %v1210_v31, 3  ;;  %v1233_v7 = vmul.f32 %v1218_v51, %v1136_v40  ;;  %v1219_v37 = vmul.f32 %v1218_v51, %v3290_v1  ;;  %v1220_v58 = vmul.f32 %v3286_v26, %v1218_v51  ;;  %v1717_v31 = vld [vmem:[#allocation6 + $0x8] sm:$0xff] }
 0x4c3   :  { %v1221_v25 = vmul.f32 %v1218_v51, %v3298_v35  ;;  %v1222_v42 = vmul.f32 %v3296_v15, %v1218_v51  ;;  %v1223_v10 = vmul.f32 %v1218_v51, %v3308_v28  ;;  %v1224_v54 = vmul.f32 %v3305_v12, %v1218_v51  ;;  %2728 = vmatprep.subr.bf16.mxu1 %v2696_v27 }
 0x4c4   :  { %v1214_v30 = vsub.f32 %v3351_v52, %v1212_v32  ;;  %v1225_v47 = vmul.f32 %v1218_v51, %v3318_v61  ;;  %v1226_v21 = vmul.f32 %v3315_v57, %v1218_v51  ;;  %v1227_v40 = vmul.f32 %v1218_v51, %v3328_v29  ;;  %2697 = vmatprep.subr.bf16.mxu0 %v2696_v27  ;;  %v1734_v32 = vld [vmem:[#allocation6 + $0x90] sm:$0xff] }
 0x4c5   :  { %v1228_v1 = vmul.f32 %v3325_v16, %v1218_v51  ;;  %v1229_v46 = vmul.f32 %v1218_v51, %v1116_v24  ;;  %v1230_v26 = vmul.f32 %v3335_v33, %v1218_v51  ;;  %v1231_v35 = vmul.f32 %v1218_v51, %v1126_v41 }
 0x4c6   :  { %v1238_v15 = vrot.slane %v1214_v30, %v354_v8  ;;  %v1232_v28 = vmul.f32 %v2556_v36, %v1218_v51  ;;  %v1234_v43 = vmul.f32 %v2559_v9, %v1218_v51  ;;  %v2698_v51 = vpack.c.bf16 %v1717_v31, %v1716_v23  ;;  %v1720_v30 = vld [vmem:[#allocation6 + $0x20] sm:$0xff] }
 0x4c8   :  { %v1239_v12 = vadd.f32 %v1238_v15, %v1219_v37  ;;  %v1240_v53 = vadd.f32 %v1238_v15, %v1220_v58  ;;  %v1241_v55 = vadd.f32 %v1238_v15, %v1221_v25  ;;  %v1242_v60 = vadd.f32 %v1238_v15, %v1222_v42  ;;  %2736 = vmatpush3.bf16.msra.mxu1 %v2698_v51  ;;  %v1718_v58 = vld [vmem:[#allocation6 + $0x10] sm:$0xff]  ;;  %v1719_v25 = vld [vmem:[#allocation6 + $0x18] sm:$0xff] }
 0x4c9   :  { %v1243_v61 = vadd.f32 %v1238_v15, %v1223_v10  ;;  %v1244_v63 = vadd.f32 %v1238_v15, %v1224_v54  ;;  %v1245_v57 = vadd.f32 %v1238_v15, %v1225_v47  ;;  %v1246_v17 = vadd.f32 %v1238_v15, %v1226_v21  ;;  %v1737_v10 = vld [vmem:[#allocation6 + $0xa8] sm:$0xff] }
 0x4ca   :  { %v1255_v29 = vmax.f32 %v1239_v12, 0.0  ;;  %v1247_v16 = vadd.f32 %v1238_v15, %v1227_v40  ;;  %v1248_v24 = vadd.f32 %v1238_v15, %v1228_v1  ;;  %v1249_v38 = vadd.f32 %v1238_v15, %v1229_v46  ;;  %v1721_v47 = vld [vmem:[#allocation6 + $0x28] sm:$0xff]  ;;  %v1738_v40 = vld [vmem:[#allocation6 + $0xb0] sm:$0xff]  ;;  %v1739_v1 = vld [vmem:[#allocation6 + $0xb8] sm:$0xff] }
 0x4cb   :  { %v1250_v33 = vadd.f32 %v1238_v15, %v1230_v26  ;;  %v1251_v41 = vadd.f32 %v1238_v15, %v1231_v35  ;;  %v1252_v8 = vadd.f32 %v1238_v15, %v1232_v28  ;;  %v1253_v36 = vadd.f32 %v1238_v15, %v1233_v7  ;;  %v1735_v7 = vld [vmem:[#allocation6 + $0x98] sm:$0xff]  ;;  %v1722_v26 = vld [vmem:[#allocation6 + $0x30] sm:$0xff]  ;;  %v1740_v28 = vld [vmem:[#allocation6 + $0xc0] sm:$0xff] }
 0x4cc   :  { %1368 = vmatmul.mubr.f32.vlgmr.msra.gmra.mrb[32].mxu0 %v1255_v29  ;;  %v1254_v9 = vadd.f32 %v1238_v15, %v1234_v43  ;;  %v1256_v4 = vmax.f32 %v1240_v53, 0.0  ;;  %v1257_v39 = vmax.f32 %v1241_v55, 0.0  ;;  %v1258_v2 = vmax.f32 %v1242_v60, 0.0  ;;  %v1723_v35 = vld [vmem:[#allocation6 + $0x38] sm:$0xff]  ;;  %v1741_v43 = vld [vmem:[#allocation6 + $0xc8] sm:$0xff]  ;;  %v1724_v53 = vld [vmem:[#allocation6 + $0x40] sm:$0xff] }
 0x4cd   :  { %1373 = vmatprep.mubr.f32.mxu0 %v2906_v0  ;;  %v1259_v18 = vmax.f32 %v1243_v61, 0.0  ;;  %v1260_v34 = vmax.f32 %v1244_v63, 0.0  ;;  %v1261_v44 = vmax.f32 %v1245_v57, 0.0  ;;  %v1262_v45 = vmax.f32 %v1246_v17, 0.0  ;;  %2699 = vmatpush3.bf16.msra.mxu0 %v2698_v51  ;;  %v1725_v55 = vld [vmem:[#allocation6 + $0x48] sm:$0xff]  ;;  %v1742_v61 = vld [vmem:[#allocation6 + $0xd0] sm:$0xff] }
 0x4ce   :  { %v1263_v49 = vmax.f32 %v1247_v16, 0.0  ;;  %v1264_v56 = vmax.f32 %v1248_v24, 0.0  ;;  %v1265_v59 = vmax.f32 %v1249_v38, 0.0  ;;  %v1266_v62 = vmax.f32 %v1250_v33, 0.0  ;;  %v1743_v63 = vld [vmem:[#allocation6 + $0xd8] sm:$0xff]  ;;  %v1726_v17 = vld [vmem:[#allocation6 + $0x50] sm:$0xff] }
 0x4cf   :  { %v1267_v3 = vmax.f32 %v1251_v41, 0.0  ;;  %v1268_v11 = vmax.f32 %v1252_v8, 0.0  ;;  %v1269_v13 = vmax.f32 %v1253_v36, 0.0  ;;  %v1270_v14 = vmax.f32 %v1254_v9, 0.0  ;;  %v1727_v29 = vld [vmem:[#allocation6 + $0x58] sm:$0xff]  ;;  %v1744_v24 = vld [vmem:[#allocation6 + $0xe0] sm:$0xff] }
 0x4d0   :  { %1374 = vmatmul.mubr.f32.gmra.mrb[34].mxu0 %v1256_v4  ;;  %v2700_v37 = vpack.c.bf16 %v1735_v7, %v1734_v32  ;;  %v2702_v42 = vpack.c.bf16 %v1719_v25, %v1718_v58  ;;  %v2706_v21 = vpack.c.bf16 %v1721_v47, %v1720_v30  ;;  %v2708_v46 = vpack.c.bf16 %v1739_v1, %v1738_v40  ;;  %v1745_v38 = vld [vmem:[#allocation6 + $0xe8] sm:$0xff]  ;;  %v1728_v33 = vld [vmem:[#allocation6 + $0x60] sm:$0xff]  ;;  %v1746_v36 = vld [vmem:[#allocation6 + $0xf0] sm:$0xff] }
 0x4d1   :  { %1379 = vmatprep.mubr.f32.mxu0 %v2906_v0  ;;  %v2710_v15 = vpack.c.bf16 %v1723_v35, %v1722_v26  ;;  %v2712_v12 = vpack.c.bf16 %v1741_v43, %v1740_v28  ;;  %v2714_v60 = vpack.c.bf16 %v1725_v55, %v1724_v53  ;;  %v2716_v57 = vpack.c.bf16 %v1743_v63, %v1742_v61  ;;  %v1729_v8 = vld [vmem:[#allocation6 + $0x68] sm:$0xff]  ;;  %v1747_v9 = vld [vmem:[#allocation6 + $0xf8] sm:$0xff] }
 0x4d2   :  { %2729 = vmatprep.subr.bf16.mxu1 %v2700_v37  ;;  %2701 = vmatprep.subr.bf16.mxu0 %v2700_v37  ;;  %v2718_v16 = vpack.c.bf16 %v1727_v29, %v1726_v17  ;;  %v2720_v41 = vpack.c.bf16 %v1745_v38, %v1744_v24  ;;  %v2722_v4 = vpack.c.bf16 %v1729_v8, %v1728_v33 }
 0x4d3   :  { %2737 = vmatpush3.bf16.msra.mxu1 %v2702_v42  ;;  %2703 = vmatpush3.bf16.msra.mxu0 %v2702_v42 }
 0x4d4   :  { %1380 = vmatmul.mubr.f32.gmra.mrb[36].mxu0 %v1257_v39  ;;  %v2724_v39 = vpack.c.bf16 %v1747_v9, %v1746_v36 }
 0x4d5   :  { %1385 = vmatprep.mubr.f32.mxu0 %v2906_v0 }
 0x4d8   :  { %1386 = vmatmul.mubr.f32.gmra.mrb[38].mxu0 %v1258_v2  ;;  %v1730_v2 = vld [vmem:[#allocation6 + $0x70] sm:$0xff] }
 0x4d9   :  { %1391 = vmatprep.mubr.f32.mxu0 %v2906_v0 }
 0x4dc   :  { %1392 = vmatmul.mubr.f32.gmra.mrb[40].mxu0 %v1259_v18  ;;  %v1731_v18 = vld [vmem:[#allocation6 + $0x78] sm:$0xff] }
 0x4dd   :  { %1397 = vmatprep.mubr.f32.mxu0 %v2906_v0 }
 0x4e0   :  { %1398 = vmatmul.mubr.f32.gmra.mrb[42].mxu0 %v1260_v34  ;;  %v2726_v34 = vpack.c.bf16 %v1731_v18, %v1730_v2 }
 0x4e1   :  { %1403 = vmatprep.mubr.f32.mxu0 %v2906_v0 }
 0x4e4   :  { %1404 = vmatmul.mubr.f32.gmra.mrb[44].mxu0 %v1261_v44 }
 0x4e5   :  { %1409 = vmatprep.mubr.f32.mxu0 %v2906_v0 }
 0x4e8   :  { %1410 = vmatmul.mubr.f32.gmra.mrb[46].mxu0 %v1262_v45 }
 0x4e9   :  { %1415 = vmatprep.mubr.f32.mxu0 %v2906_v0 }
 0x4ec   :  { %1416 = vmatmul.mubr.f32.gmra.mrb[48].mxu0 %v1263_v49 }
 0x4ed   :  { %1421 = vmatprep.mubr.f32.mxu0 %v2906_v0 }
 0x4f0   :  { %1422 = vmatmul.mubr.f32.gmra.mrb[50].mxu0 %v1264_v56 }
 0x4f1   :  { %1427 = vmatprep.mubr.f32.mxu0 %v2906_v0 }
 0x4f4   :  { %1428 = vmatmul.mubr.f32.gmra.mrb[52].mxu0 %v1265_v59 }
 0x4f5   :  { %1433 = vmatprep.mubr.f32.mxu0 %v2906_v0 }
 0x4f8   :  { %1434 = vmatmul.mubr.f32.gmra.mrb[54].mxu0 %v1266_v62 }
 0x4f9   :  { %1439 = vmatprep.mubr.f32.mxu0 %v2906_v0 }
 0x4fc   :  { %1440 = vmatmul.mubr.f32.gmra.mrb[56].mxu0 %v1267_v3 }
 0x4fd   :  { %1445 = vmatprep.mubr.f32.mxu0 %v2906_v0 }
 0x500   :  { %1446 = vmatmul.mubr.f32.gmra.mrb[58].mxu0 %v1268_v11 }
 0x501   :  { %1451 = vmatprep.mubr.f32.mxu0 %v2906_v0 }
 0x504   :  { %1452 = vmatmul.mubr.f32.gmra.mrb[60].mxu0 %v1269_v13 }
 0x505   :  { %1457 = vmatprep.mubr.f32.mxu0 %v2906_v0  ;;  %v1736_v0 = vld [vmem:[#allocation6 + $0xa0] sm:$0xff] }
 0x506   :  { %v2704_v54 = vpack.c.bf16 %v1737_v10, %v1736_v0 }
 0x508   :  { %1458 = vmatmul.mubr.f32.gmra.mrb[62].mxu0 %v1270_v14  ;;  %2730 = vmatprep.subr.bf16.mxu1 %v2704_v54 }
 0x509   :  { %2705 = vmatprep.subr.bf16.mxu0 %v2704_v54  ;;  %2738 = vmatpush3.bf16.msra.mxu1 %v2706_v21 }
 0x50a   :  { %2707 = vmatpush3.bf16.msra.mxu0 %v2706_v21  ;;  %2731 = vmatprep.subr.bf16.mxu1 %v2708_v46 }
 0x50b   :  { %2709 = vmatprep.subr.bf16.mxu0 %v2708_v46 }
 0x50d   :  { %2739 = vmatpush3.bf16.msra.mxu1 %v2710_v15 }
 0x50e   :  { %2711 = vmatpush3.bf16.msra.mxu0 %v2710_v15  ;;  %2732 = vmatprep.subr.bf16.mxu1 %v2712_v12 }
 0x50f   :  { %2713 = vmatprep.subr.bf16.mxu0 %v2712_v12 }
 0x511   :  { %2740 = vmatpush3.bf16.msra.mxu1 %v2714_v60 }
 0x512   :  { %2715 = vmatpush3.bf16.msra.mxu0 %v2714_v60  ;;  %2733 = vmatprep.subr.bf16.mxu1 %v2716_v57 }
 0x513   :  { %2717 = vmatprep.subr.bf16.mxu0 %v2716_v57 }
 0x515   :  { %2741 = vmatpush3.bf16.msra.mxu1 %v2718_v16 }
 0x516   :  { %2719 = vmatpush3.bf16.msra.mxu0 %v2718_v16  ;;  %2734 = vmatprep.subr.bf16.mxu1 %v2720_v41 }
 0x517   :  { %2721 = vmatprep.subr.bf16.mxu0 %v2720_v41 }
 0x519   :  { %2742 = vmatpush3.bf16.msra.mxu1 %v2722_v4 }
 0x51a   :  { %2723 = vmatpush3.bf16.msra.mxu0 %v2722_v4  ;;  %2735 = vmatprep.subr.bf16.mxu1 %v2724_v39 }
 0x51b   :  { %2725 = vmatprep.subr.bf16.mxu0 %v2724_v39 }
 0x51d   :  { %2743 = vmatpush3.bf16.msra.mxu1 %v2726_v34 }
 0x51e   :  { %2727 = vmatpush3.bf16.msra.mxu0 %v2726_v34 }
 0x59f   :  { %v3382_v44 = vpop.f32.mrb[32].mxu0 }
 0x5a0   :  { %v3384_v45 = vpop.f32.mrb[33].mxu0  ;;  %v1506_v56 = vmul.f32 %v3382_v44, %v3382_v44 }
 0x5a1   :  { %v1507_v11 = vmul.f32 %v3384_v45, %v3384_v45 }
 0x5a3   :  { %v3386_v49 = vpop.f32.mrb[34].mxu0 }
 0x5a4   :  { %v1464_v59 = vadd.f32 %v3386_v49, %v3382_v44  ;;  %v1508_v62 = vmul.f32 %v3386_v49, %v3386_v49  ;;  %v3394_v3 = vpop.f32.mrb[35].mxu0 }
 0x5a5   :  { %v1485_v13 = vadd.f32 %v3394_v3, %v3384_v45  ;;  %v1509_v14 = vmul.f32 %v3394_v3, %v3394_v3 }
 0x5a6   :  { %v1538_v19 = vadd.f32 %v1508_v62, %v1506_v56 }
 0x5a7   :  { %v1559_v22 = vadd.f32 %v1509_v14, %v1507_v11  ;;  %v3402_v27 = vpop.f32.mrb[36].mxu0 }
 0x5a8   :  { %v1465_v23 = vadd.f32 %v1464_v59, %v3402_v27  ;;  %v1510_v31 = vmul.f32 %v3402_v27, %v3402_v27  ;;  %v3407_v51 = vpop.f32.mrb[37].mxu0 }
 0x5a9   :  { %v1486_v32 = vadd.f32 %v1485_v13, %v3407_v51  ;;  %v1511_v7 = vmul.f32 %v3407_v51, %v3407_v51 }
 0x5aa   :  { %v1539_v37 = vadd.f32 %v1538_v19, %v1510_v31 }
 0x5ab   :  { %v1560_v58 = vadd.f32 %v1559_v22, %v1511_v7  ;;  %v3412_v25 = vpop.f32.mrb[38].mxu0 }
 0x5ac   :  { %v1466_v42 = vadd.f32 %v1465_v23, %v3412_v25  ;;  %v1512_v0 = vmul.f32 %v3412_v25, %v3412_v25  ;;  %v3417_v10 = vpop.f32.mrb[39].mxu0 }
 0x5ad   :  { %v1487_v54 = vadd.f32 %v1486_v32, %v3417_v10  ;;  %v1513_v30 = vmul.f32 %v3417_v10, %v3417_v10 }
 0x5ae   :  { %v1540_v47 = vadd.f32 %v1539_v37, %v1512_v0 }
 0x5af   :  { %v1561_v21 = vadd.f32 %v1560_v58, %v1513_v30  ;;  %v3422_v40 = vpop.f32.mrb[40].mxu0 }
 0x5b0   :  { %v1467_v1 = vadd.f32 %v1466_v42, %v3422_v40  ;;  %v1514_v46 = vmul.f32 %v3422_v40, %v3422_v40  ;;  %v3427_v26 = vpop.f32.mrb[41].mxu0 }
 0x5b1   :  { %v1488_v35 = vadd.f32 %v1487_v54, %v3427_v26  ;;  %v1515_v15 = vmul.f32 %v3427_v26, %v3427_v26 }
 0x5b2   :  { %v1541_v28 = vadd.f32 %v1540_v47, %v1514_v46 }
 0x5b3   :  { %v1562_v43 = vadd.f32 %v1561_v21, %v1515_v15  ;;  %v3432_v12 = vpop.f32.mrb[42].mxu0 }
 0x5b4   :  { %v1468_v53 = vadd.f32 %v1467_v1, %v3432_v12  ;;  %v1516_v55 = vmul.f32 %v3432_v12, %v3432_v12  ;;  %v3437_v60 = vpop.f32.mrb[43].mxu0 }
 0x5b5   :  { %v1489_v61 = vadd.f32 %v1488_v35, %v3437_v60  ;;  %v1517_v63 = vmul.f32 %v3437_v60, %v3437_v60 }
 0x5b6   :  { %v1542_v57 = vadd.f32 %v1541_v28, %v1516_v55 }
 0x5b7   :  { %v1563_v17 = vadd.f32 %v1562_v43, %v1517_v63  ;;  %v3442_v29 = vpop.f32.mrb[44].mxu0 }
 0x5b8   :  { %v1469_v16 = vadd.f32 %v1468_v53, %v3442_v29  ;;  %v1518_v24 = vmul.f32 %v3442_v29, %v3442_v29  ;;  %v3447_v38 = vpop.f32.mrb[45].mxu0 }
 0x5b9   :  { %v1490_v33 = vadd.f32 %v1489_v61, %v3447_v38  ;;  %v1519_v41 = vmul.f32 %v3447_v38, %v3447_v38 }
 0x5ba   :  { %v1543_v8 = vadd.f32 %v1542_v57, %v1518_v24 }
 0x5bb   :  { %v1564_v36 = vadd.f32 %v1563_v17, %v1519_v41  ;;  %v3452_v9 = vpop.f32.mrb[46].mxu0 }
 0x5bc   :  { %v1470_v4 = vadd.f32 %v1469_v16, %v3452_v9  ;;  %v1520_v39 = vmul.f32 %v3452_v9, %v3452_v9  ;;  %v3457_v2 = vpop.f32.mrb[47].mxu0 }
 0x5bd   :  { %v1491_v18 = vadd.f32 %v1490_v33, %v3457_v2  ;;  %v1521_v34 = vmul.f32 %v3457_v2, %v3457_v2 }
 0x5be   :  { %v1544_v56 = vadd.f32 %v1543_v8, %v1520_v39 }
 0x5bf   :  { %v1565_v59 = vadd.f32 %v1564_v36, %v1521_v34  ;;  %v3462_v62 = vpop.f32.mrb[48].mxu0 }
 0x5c0   :  { %v1471_v11 = vadd.f32 %v1470_v4, %v3462_v62  ;;  %v1522_v13 = vmul.f32 %v3462_v62, %v3462_v62  ;;  %v3467_v14 = vpop.f32.mrb[49].mxu0 }
 0x5c1   :  { %v1492_v19 = vadd.f32 %v1491_v18, %v3467_v14  ;;  %v1523_v22 = vmul.f32 %v3467_v14, %v3467_v14 }
 0x5c2   :  { %v1545_v23 = vadd.f32 %v1544_v56, %v1522_v13 }
 0x5c3   :  { %v1566_v31 = vadd.f32 %v1565_v59, %v1523_v22  ;;  %v3472_v32 = vpop.f32.mrb[50].mxu0 }
 0x5c4   :  { %v1472_v7 = vadd.f32 %v1471_v11, %v3472_v32  ;;  %v1524_v37 = vmul.f32 %v3472_v32, %v3472_v32  ;;  %v3477_v58 = vpop.f32.mrb[51].mxu0 }
 0x5c5   :  { %v1493_v42 = vadd.f32 %v1492_v19, %v3477_v58  ;;  %v1525_v0 = vmul.f32 %v3477_v58, %v3477_v58 }
 0x5c6   :  { %v1546_v54 = vadd.f32 %v1545_v23, %v1524_v37 }
 0x5c7   :  { %v1567_v30 = vadd.f32 %v1566_v31, %v1525_v0  ;;  %v3482_v47 = vpop.f32.mrb[52].mxu0 }
 0x5c8   :  { %v1473_v21 = vadd.f32 %v1472_v7, %v3482_v47  ;;  %v1526_v1 = vmul.f32 %v3482_v47, %v3482_v47  ;;  %v3487_v46 = vpop.f32.mrb[53].mxu0 }
 0x5c9   :  { %v1494_v35 = vadd.f32 %v1493_v42, %v3487_v46  ;;  %v1527_v15 = vmul.f32 %v3487_v46, %v3487_v46 }
 0x5ca   :  { %v1547_v28 = vadd.f32 %v1546_v54, %v1526_v1 }
 0x5cb   :  { %v1568_v43 = vadd.f32 %v1567_v30, %v1527_v15  ;;  %v3492_v53 = vpop.f32.mrb[54].mxu0 }
 0x5cc   :  { %v1474_v55 = vadd.f32 %v1473_v21, %v3492_v53  ;;  %v1528_v61 = vmul.f32 %v3492_v53, %v3492_v53  ;;  %v3497_v63 = vpop.f32.mrb[55].mxu0 }
 0x5cd   :  { %v1495_v57 = vadd.f32 %v1494_v35, %v3497_v63  ;;  %v1529_v17 = vmul.f32 %v3497_v63, %v3497_v63 }
 0x5ce   :  { %v1548_v16 = vadd.f32 %v1547_v28, %v1528_v61 }
 0x5cf   :  { %v1569_v24 = vadd.f32 %v1568_v43, %v1529_v17  ;;  %v3502_v33 = vpop.f32.mrb[56].mxu0 }
 0x5d0   :  { %v1475_v41 = vadd.f32 %v1474_v55, %v3502_v33  ;;  %v1530_v8 = vmul.f32 %v3502_v33, %v3502_v33  ;;  %v3507_v36 = vpop.f32.mrb[57].mxu0 }
 0x5d1   :  { %v1496_v4 = vadd.f32 %v1495_v57, %v3507_v36  ;;  %v1531_v39 = vmul.f32 %v3507_v36, %v3507_v36 }
 0x5d2   :  { %v1549_v18 = vadd.f32 %v1548_v16, %v1530_v8 }
 0x5d3   :  { %v1570_v34 = vadd.f32 %v1569_v24, %v1531_v39  ;;  %v3512_v56 = vpop.f32.mrb[58].mxu0 }
 0x5d4   :  { %v1476_v59 = vadd.f32 %v1475_v41, %v3512_v56  ;;  %v1532_v11 = vmul.f32 %v3512_v56, %v3512_v56  ;;  %v3517_v13 = vpop.f32.mrb[59].mxu0 }
 0x5d5   :  { %v1497_v19 = vadd.f32 %v1496_v4, %v3517_v13  ;;  %v1533_v22 = vmul.f32 %v3517_v13, %v3517_v13 }
 0x5d6   :  { %v1550_v23 = vadd.f32 %v1549_v18, %v1532_v11 }
 0x5d7   :  { %v1571_v31 = vadd.f32 %v1570_v34, %v1533_v22  ;;  %v3522_v7 = vpop.f32.mrb[60].mxu0 }
 0x5d8   :  { %v1477_v37 = vadd.f32 %v1476_v59, %v3522_v7  ;;  %v1534_v42 = vmul.f32 %v3522_v7, %v3522_v7  ;;  %v3527_v0 = vpop.f32.mrb[61].mxu0 }
 0x5d9   :  { %v1498_v54 = vadd.f32 %v1497_v19, %v3527_v0  ;;  %v1535_v30 = vmul.f32 %v3527_v0, %v3527_v0 }
 0x5da   :  { %v1551_v21 = vadd.f32 %v1550_v23, %v1534_v42 }
 0x5db   :  { %v1572_v1 = vadd.f32 %v1571_v31, %v1535_v30  ;;  %v1459_v35 = vpop.f32.mrb[62].mxu0 }
 0x5dc   :  { %v1478_v15 = vadd.f32 %v1477_v37, %v1459_v35  ;;  %v1536_v28 = vmul.f32 %v1459_v35, %v1459_v35  ;;  %v1461_v43 = vpop.f32.mrb[63].mxu0 }
 0x5dd   :  { %v1499_v55 = vadd.f32 %v1498_v54, %v1461_v43  ;;  %v1537_v61 = vmul.f32 %v1461_v43, %v1461_v43 }
 0x5de   :  { %v1479_v57 = vrot.slane %v1478_v15, 4  ;;  %v1552_v17 = vadd.f32 %v1551_v21, %v1536_v28 }
 0x5df   :  { %v1500_v16 = vrot.slane %v1499_v55, 4  ;;  %v1573_v24 = vadd.f32 %v1572_v1, %v1537_v61 }
 0x5e0   :  { %v1480_v41 = vadd.f32 %v1479_v57, %v1478_v15  ;;  %v1553_v8 = vrot.slane %v1552_v17, 4 }
 0x5e1   :  { %v1501_v4 = vadd.f32 %v1500_v16, %v1499_v55  ;;  %v1574_v39 = vrot.slane %v1573_v24, 4 }
 0x5e2   :  { %v1481_v18 = vrot.slane %v1480_v41, 2  ;;  %v1554_v34 = vadd.f32 %v1553_v8, %v1552_v17 }
 0x5e3   :  { %v1502_v59 = vrot.slane %v1501_v4, 2  ;;  %v1575_v11 = vadd.f32 %v1574_v39, %v1573_v24 }
 0x5e4   :  { %v1482_v19 = vadd.f32 %v1481_v18, %v1480_v41  ;;  %v1555_v22 = vrot.slane %v1554_v34, 2 }
 0x5e5   :  { %v1503_v23 = vadd.f32 %v1502_v59, %v1501_v4  ;;  %v1576_v31 = vrot.slane %v1575_v11, 2  ;;  %v65_v59 = vld [vmem:[%s3956_s5 + $0x8] sm:$0xff] }
 0x5e6   :  { %v1483_v37 = vrot.slane %v1482_v19, 1  ;;  %v1556_v42 = vadd.f32 %v1555_v22, %v1554_v34  ;;  %v1606_v34 = vsub.s32 4, %v3115_v6 }
 0x5e7   :  { %v1504_v54 = vrot.slane %v1503_v23, 1  ;;  %v1577_v30 = vadd.f32 %v1576_v31, %v1575_v11 }
 0x5e8   :  { %v1484_v5 = vadd.f32 %v1483_v37, %v1482_v19  ;;  %v1557_v21 = vrot.slane %v1556_v42, 1 }
 0x5e9   :  { %v1505_v28 = vadd.f32 %v1504_v54, %v1503_v23  ;;  %v1578_v1 = vrot.slane %v1577_v30, 1 }
 0x5ea   :  { %v1558_v15 = vadd.f32 %v1557_v21, %v1556_v42  ;;  %v1580_v61 = vmul.f32 0.0078125, %v1484_v5  ;;  %v67_v21 = vld [vmem:[%s3956_s5 + $0x18] sm:$0x7] }
 0x5eb   :  { %v1579_v55 = vadd.f32 %v1578_v1, %v1577_v30  ;;  %v1581_v57 = vmul.f32 0.0078125, %v1505_v28 }
 0x5ec   :  { %v1582_v16 = vmul.f32 0.0078125, %v1558_v15  ;;  %v1584_v17 = vmul.f32 %v1580_v61, %v1580_v61 }
 0x5ed   :  { %v1583_v8 = vmul.f32 0.0078125, %v1579_v55  ;;  %v1585_v24 = vmul.f32 %v1581_v57, %v1581_v57 }
 0x5ee   :  { %v1586_v41 = vsub.f32 %v1582_v16, %v1584_v17 }
 0x5ef   :  { %v1587_v39 = vsub.f32 %v1583_v8, %v1585_v24 }
 0x5f0   :  { %v1588_v4 = vadd.f32 1e-05, %v1586_v41 }
 0x5f1   :  { %v1589_v18 = vadd.f32 1e-05, %v1587_v39 }
 0x5f2   :  { %2760 = vrsqrt.f32 %v1588_v4 }
 0x5f3   :  { %2762 = vrsqrt.f32 %v1589_v18 }
 0x5fc   :  { %v2761_v11 = vpop.eup %2760 }
 0x5fd   :  { %v2763_v5 = vpop.eup %2762  ;;  %v1592_v19 = vmul.f32 %v3345_v48, %v2761_v11 }
 0x5fe   :  { %v1593_v22 = vmul.f32 %v2763_v5, %v65_v59 }
 0x5ff   :  { %v1594_v23 = vmul.f32 %v1592_v19, %v1580_v61  ;;  %v3537_v31 = vrot.slane %v1592_v19, %v1606_v34 }
 0x600   :  { %v1595_v37 = vmul.f32 %v1593_v22, %v1581_v57  ;;  %v3539_v42 = vrot.slane %v1593_v22, %v1606_v34 }
 0x601   :  { %v1598_v54 = vrot.slane %v1594_v23, 3  ;;  %v3542_v30 = vmul.f32 %v3537_v31, %v1459_v35  ;;  %v1612_v28 = vmul.f32 %v3537_v31, %v3382_v44  ;;  %v1618_v48 = vmul.f32 %v3537_v31, %v3412_v25 }
 0x602   :  { %v1599_v1 = vrot.slane %v1595_v37, 3  ;;  %v3552_v15 = vmul.f32 %v3539_v42, %v1461_v43  ;;  %v1613_v61 = vmul.f32 %v3539_v42, %v3384_v45  ;;  %v1619_v35 = vmul.f32 %v3539_v42, %v3417_v10 }
 0x603   :  { %v1602_v55 = vsub.f32 %v3351_v52, %v1598_v54  ;;  %v1615_v57 = vmul.f32 %v3539_v42, %v3394_v3  ;;  %v1621_v44 = vmul.f32 %v3539_v42, %v3427_v26  ;;  %v1614_v25 = vmul.f32 %v3537_v31, %v3386_v49 }
 0x604   :  { %v1603_v16 = vsub.f32 %v67_v21, %v1599_v1  ;;  %v1620_v43 = vmul.f32 %v3537_v31, %v3422_v40  ;;  %v1617_v45 = vmul.f32 %v3539_v42, %v3407_v51  ;;  %v1623_v10 = vmul.f32 %v3539_v42, %v3437_v60 }
 0x605   :  { %v3572_v17 = vrot.slane %v1602_v55, %v3196_v50  ;;  %v1616_v3 = vmul.f32 %v3537_v31, %v3402_v27  ;;  %v1622_v26 = vmul.f32 %v3537_v31, %v3432_v12  ;;  %v1625_v49 = vmul.f32 %v3539_v42, %v3447_v38 }
 0x606   :  { %v3581_v40 = vrot.slane %v1603_v16, %v3196_v50  ;;  %v1624_v51 = vmul.f32 %v3537_v31, %v3442_v29  ;;  %v1627_v60 = vmul.f32 %v3539_v42, %v3457_v2  ;;  %v1626_v8 = vmul.f32 %v3537_v31, %v3452_v9 }
 0x607   :  { %v1652_v27 = vadd.f32 %v3572_v17, %v1612_v28  ;;  %v1658_v24 = vadd.f32 %v3572_v17, %v1618_v48  ;;  %v1654_v12 = vadd.f32 %v3572_v17, %v1614_v25  ;;  %v1660_v38 = vadd.f32 %v3572_v17, %v1620_v43 }
 0x608   :  { %v1653_v50 = vadd.f32 %v3581_v40, %v1613_v61  ;;  %v1659_v41 = vadd.f32 %v3581_v40, %v1619_v35  ;;  %v1655_v29 = vadd.f32 %v3581_v40, %v1615_v57  ;;  %v1661_v39 = vadd.f32 %v3581_v40, %v1621_v44 }
 0x609   :  { %v1684_v2 = vmax.f32 %v1652_v27, 0.0  ;;  %v1690_v9 = vmax.f32 %v1658_v24, 0.0  ;;  %v1657_v59 = vadd.f32 %v3581_v40, %v1617_v45  ;;  %v1663_v11 = vadd.f32 %v3581_v40, %v1623_v10 }
 0x60a   :  { %v1685_v4 = vmax.f32 %v1653_v50, 0.0  ;;  %v1691_v18 = vmax.f32 %v1659_v41, 0.0  ;;  %v1687_v34 = vmax.f32 %v1655_v29, 0.0  ;;  %v1656_v5 = vadd.f32 %v3572_v17, %v1616_v3 }
 0x60b   :  { %v1662_v19 = vadd.f32 %v3572_v17, %v1622_v26  ;;  %v1693_v22 = vmax.f32 %v1661_v39, 0.0  ;;  %v1665_v23 = vadd.f32 %v3581_v40, %v1625_v49  ;;  %v1664_v37 = vadd.f32 %v3572_v17, %v1624_v51 }
 0x60c   :  { %1816 = vmatprep.mubr.f32.mxu0 %v1685_v4  ;;  %1831 = vmatprep.mubr.f32.mxu1 %v1691_v18  ;;  %v1667_v54 = vadd.f32 %v3581_v40, %v1627_v60  ;;  %v1686_v21 = vmax.f32 %v1654_v12, 0.0  ;;  %v1692_v28 = vmax.f32 %v1660_v38, 0.0  ;;  %v1689_v48 = vmax.f32 %v1657_v59, 0.0 }
 0x60d   :  { %1817 = vmatmul.mubr.f32.vlgmr.msra.gmra.mrb[64].mxu0 %v1684_v2  ;;  %1832 = vmatmul.mubr.f32.vlgmr.msra.gmra.mrb[32].mxu1 %v1690_v9  ;;  %v1666_v1 = vadd.f32 %v3572_v17, %v1626_v8  ;;  %v1629_v61 = vmul.f32 %v3539_v42, %v3467_v14  ;;  %v1628_v35 = vmul.f32 %v3537_v31, %v3462_v62  ;;  %v1695_v44 = vmax.f32 %v1663_v11, 0.0 }
 0x60e   :  { %1821 = vmatprep.mubr.f32.mxu0 %v1687_v34  ;;  %1836 = vmatprep.mubr.f32.mxu1 %v1693_v22  ;;  %v1631_v55 = vmul.f32 %v3539_v42, %v3477_v58  ;;  %v1630_v57 = vmul.f32 %v3537_v31, %v3472_v32  ;;  %v1633_v25 = vmul.f32 %v3539_v42, %v3487_v46  ;;  %v1694_v10 = vmax.f32 %v1662_v19, 0.0 }
 0x60f   :  { %v1632_v16 = vmul.f32 %v3537_v31, %v3482_v47  ;;  %v1635_v43 = vmul.f32 %v3539_v42, %v3497_v63  ;;  %v1669_v62 = vadd.f32 %v3581_v40, %v1629_v61  ;;  %v1668_v14 = vadd.f32 %v3572_v17, %v1628_v35 }
 0x610   :  { %v1671_v58 = vadd.f32 %v3581_v40, %v1631_v55  ;;  %v1670_v32 = vadd.f32 %v3572_v17, %v1630_v57  ;;  %v1673_v46 = vadd.f32 %v3581_v40, %v1633_v25  ;;  %v1688_v47 = vmax.f32 %v1656_v5, 0.0 }
 0x611   :  { %1822 = vmatmul.mubr.f32.gmra.mrb[66].mxu0 %v1686_v21  ;;  %1837 = vmatmul.mubr.f32.gmra.mrb[34].mxu1 %v1692_v28  ;;  %v1672_v45 = vadd.f32 %v3572_v17, %v1632_v16  ;;  %v1675_v63 = vadd.f32 %v3581_v40, %v1635_v43  ;;  %v1697_v3 = vmax.f32 %v1665_v23, 0.0  ;;  %v1634_v26 = vmul.f32 %v3537_v31, %v3492_v53 }
 0x612   :  { %1826 = vmatprep.mubr.f32.mxu0 %v1689_v48  ;;  %1841 = vmatprep.mubr.f32.mxu1 %v1695_v44  ;;  %v1696_v49 = vmax.f32 %v1664_v37, 0.0  ;;  %v1637_v51 = vmul.f32 %v3539_v42, %v3507_v36  ;;  %v1636_v60 = vmul.f32 %v3537_v31, %v3502_v33  ;;  %v1639_v8 = vmul.f32 %v3539_v42, %v3517_v13 }
 0x613   :  { %v1674_v27 = vadd.f32 %v3572_v17, %v1634_v26  ;;  %v1638_v24 = vmul.f32 %v3537_v31, %v3512_v56  ;;  %v1641_v53 = vmul.f32 %v3539_v42, %v3527_v0  ;;  %v1640_v12 = vmul.f32 %v3537_v31, %v3522_v7 }
 0x614   :  { %v1677_v36 = vadd.f32 %v3581_v40, %v1637_v51  ;;  %v1676_v38 = vadd.f32 %v3572_v17, %v1636_v60  ;;  %v1679_v33 = vadd.f32 %v3581_v40, %v1639_v8  ;;  %v1683_v13 = vadd.f32 %v3581_v40, %v3552_v15 }
 0x615   :  { %1827 = vmatmul.mubr.f32.gmra.mrb[68].mxu0 %v1688_v47  ;;  %1842 = vmatmul.mubr.f32.gmra.mrb[36].mxu1 %v1694_v10  ;;  %v1699_v50 = vmax.f32 %v1667_v54, 0.0  ;;  %v1678_v41 = vadd.f32 %v3572_v17, %v1638_v24  ;;  %v1681_v56 = vadd.f32 %v3581_v40, %v1641_v53  ;;  %v1680_v29 = vadd.f32 %v3572_v17, %v1640_v12 }
 0x616   :  { %1846 = vmatprep.mubr.f32.mxu1 %v1697_v3  ;;  %v1682_v7 = vadd.f32 %v3572_v17, %v3542_v30  ;;  %v1698_v0 = vmax.f32 %v1666_v1, 0.0  ;;  %v1701_v31 = vmax.f32 %v1669_v62, 0.0  ;;  %v1700_v42 = vmax.f32 %v1668_v14, 0.0 }
 0x617   :  { %v1703_v39 = vmax.f32 %v1671_v58, 0.0  ;;  %v1702_v15 = vmax.f32 %v1670_v32, 0.0  ;;  %v1705_v2 = vmax.f32 %v1673_v46, 0.0  ;;  %v1704_v40 = vmax.f32 %v1672_v45, 0.0 }
 0x618   :  { %v1707_v4 = vmax.f32 %v1675_v63, 0.0  ;;  %v1706_v18 = vmax.f32 %v1674_v27, 0.0  ;;  %v1709_v9 = vmax.f32 %v1677_v36, 0.0  ;;  %v1708_v30 = vmax.f32 %v1676_v38, 0.0 }
 0x619   :  { %1847 = vmatmul.mubr.f32.gmra.mrb[38].mxu1 %v1696_v49  ;;  %v1711_v17 = vmax.f32 %v1679_v33, 0.0  ;;  %v1710_v34 = vmax.f32 %v1678_v41, 0.0  ;;  %v1713_v59 = vmax.f32 %v1681_v56, 0.0  ;;  %v1712_v11 = vmax.f32 %v1680_v29, 0.0 }
 0x61a   :  { %1851 = vmatprep.mubr.f32.mxu1 %v1699_v50  ;;  %v1715_v5 = vmax.f32 %v1683_v13, 0.0  ;;  %v1714_v19 = vmax.f32 %v1682_v7, 0.0  ;;  %v3654_v22 = vrot.slane %v3351_v52, %v929_v20  ;;  %v3959_v33 = vlaneseq }
 0x61c   :  { %v3684_v13 = vand.u32 127, %v3959_v33 }
 0x61d   :  { %1852 = vmatmul.mubr.f32.gmra.mrb[40].mxu1 %v1698_v0 }
 0x61e   :  { %1856 = vmatprep.mubr.f32.mxu1 %v1701_v31  ;;  %vm1899_vm1 = vcmp.ge.s32.totalorder %v3684_v13, 8  ;;  %vm1900_vm2 = vcmp.lt.s32.totalorder %v3684_v13, 16 }
 0x61f   :  { %vm3732_vm11 = vmand %vm1899_vm1, %vm1900_vm2 }
 0x621   :  { %1857 = vmatmul.mubr.f32.gmra.mrb[42].mxu1 %v1700_v42 }
 0x622   :  { %1861 = vmatprep.mubr.f32.mxu1 %v1703_v39 }
 0x625   :  { %1862 = vmatmul.mubr.f32.gmra.mrb[44].mxu1 %v1702_v15 }
 0x626   :  { %1866 = vmatprep.mubr.f32.mxu1 %v1705_v2 }
 0x629   :  { %1867 = vmatmul.mubr.f32.gmra.mrb[46].mxu1 %v1704_v40 }
 0x62a   :  { %1871 = vmatprep.mubr.f32.mxu1 %v1707_v4 }
 0x62d   :  { %1872 = vmatmul.mubr.f32.gmra.mrb[48].mxu1 %v1706_v18 }
 0x62e   :  { %1876 = vmatprep.mubr.f32.mxu1 %v1709_v9 }
 0x631   :  { %1877 = vmatmul.mubr.f32.gmra.mrb[50].mxu1 %v1708_v30 }
 0x632   :  { %1881 = vmatprep.mubr.f32.mxu1 %v1711_v17 }
 0x635   :  { %1882 = vmatmul.mubr.f32.gmra.mrb[52].mxu1 %v1710_v34 }
 0x636   :  { %1886 = vmatprep.mubr.f32.mxu1 %v1713_v59 }
 0x639   :  { %1887 = vmatmul.mubr.f32.gmra.mrb[54].mxu1 %v1712_v11 }
 0x63a   :  { %1891 = vmatprep.mubr.f32.mxu1 %v1715_v5 }
 0x63d   :  { %1892 = vmatmul.mubr.f32.gmra.mrb[56].mxu1 %v1714_v19 }
 0x6e0   :  { %v2312_v23 = vpop.f32.mrb[64].mxu0  ;;  %v2321_v37 = vpop.f32.mrb[32].mxu1 }
 0x6e1   :  { %v2313_v54 = vpop.f32.mrb[65].mxu0  ;;  %v2322_v21 = vpop.f32.mrb[33].mxu1 }
 0x6e2   :  { %v2314_v28 = vadd.f32 %v2313_v54, %v2312_v23  ;;  %v2323_v48 = vadd.f32 %v2322_v21, %v2321_v37 }
 0x6e4   :  { %v3657_v1 = vadd.f32 %v2314_v28, %v3654_v22  ;;  %v3660_v61 = vadd.f32 %v2323_v48, %v3654_v22  ;;  %v2315_v35 = vpop.f32.mrb[66].mxu0  ;;  %v2324_v55 = vpop.f32.mrb[34].mxu1 }
 0x6e5   :  { %v2316_v57 = vpop.f32.mrb[67].mxu0  ;;  %v2325_v44 = vpop.f32.mrb[35].mxu1 }
 0x6e6   :  { %v1918_v6 = vmul.f32 1.442695, %v3657_v1  ;;  %v1924_v20 = vmul.f32 1.442695, %v3660_v61  ;;  %v2317_v52 = vadd.f32 %v2316_v57, %v2315_v35  ;;  %v2326_v25 = vadd.f32 %v2325_v44, %v2324_v55 }
 0x6e7   :  { %vm1902_vm3 = vcmp.gt.f32.partialorder %v3657_v1, 20.0  ;;  %vm1905_vm5 = vcmp.gt.f32.partialorder %v3660_v61, 20.0 }
 0x6e8   :  { %2764 = vpow2.f32 %v1918_v6  ;;  %v2318_v16 = vpop.f32.mrb[68].mxu0  ;;  %v2327_v43 = vpop.f32.mrb[36].mxu1  ;;  %v3665_v62 = vadd.f32 %v2317_v52, %v3654_v22  ;;  %v3668_v14 = vadd.f32 %v2326_v25, %v3654_v22 }
 0x6e9   :  { %2766 = vpow2.f32 %v1924_v20  ;;  %v2319_v58 = vpop.f32.mrb[69].mxu0  ;;  %v2328_v32 = vpop.f32.mrb[37].mxu1 }
 0x6ea   :  { %v2320_v46 = vadd.f32 %v2319_v58, %v2318_v16  ;;  %v2329_v45 = vadd.f32 %v2328_v32, %v2327_v43  ;;  %v1920_v47 = vmul.f32 1.442695, %v3665_v62  ;;  %v1926_v10 = vmul.f32 1.442695, %v3668_v14 }
 0x6eb   :  { %vm1903_vm7 = vcmp.gt.f32.partialorder %v3665_v62, 20.0  ;;  %vm1906_vm10 = vcmp.gt.f32.partialorder %v3668_v14, 20.0 }
 0x6ec   :  { %v3673_v63 = vadd.f32 %v2320_v46, %v3654_v22  ;;  %v3676_v3 = vadd.f32 %v2329_v45, %v3654_v22  ;;  %v2330_v26 = vpop.f32.mrb[38].mxu1  ;;  %2768 = vpow2.f32 %v1920_v47 }
 0x6ed   :  { %v2331_v49 = vpop.f32.mrb[39].mxu1  ;;  %2770 = vpow2.f32 %v1926_v10 }
 0x6ee   :  { %v1922_v51 = vmul.f32 1.442695, %v3673_v63  ;;  %v1928_v60 = vmul.f32 1.442695, %v3676_v3  ;;  %v2332_v8 = vadd.f32 %v2331_v49, %v2330_v26  ;;  %vm1904_vm12 = vcmp.gt.f32.partialorder %v3673_v63, 20.0 }
 0x6ef   :  { %vm1907_vm14 = vcmp.gt.f32.partialorder %v3676_v3, 20.0 }
 0x6f0   :  { %2772 = vpow2.f32 %v1922_v51  ;;  %v2333_v27 = vpop.f32.mrb[40].mxu1  ;;  %v3681_v24 = vadd.f32 %v2332_v8, %v3654_v22 }
 0x6f1   :  { %2774 = vpow2.f32 %v1928_v60  ;;  %v2334_v53 = vpop.f32.mrb[41].mxu1 }
 0x6f2   :  { %v2765_v12 = vpop.eup %2764  ;;  %v2335_v36 = vadd.f32 %v2334_v53, %v2333_v27  ;;  %v1930_v56 = vmul.f32 1.442695, %v3681_v24  ;;  %vm1908_vm0 = vcmp.gt.f32.partialorder %v3681_v24, 20.0 }
 0x6f3   :  { %v2767_v38 = vpop.eup %2766  ;;  %v1950_v50 = vadd.f32 1.0, %v2765_v12  ;;  %v1953_v29 = vmul.f32 -0.5, %v2765_v12  ;;  %v1956_v31 = vand.u32 2147483647, %v2765_v12 }
 0x6f4   :  { %v1977_v41 = vadd.f32 1.0, %v2767_v38  ;;  %v3688_v7 = vadd.f32 %v2335_v36, %v3654_v22  ;;  %v2336_v0 = vpop.f32.mrb[42].mxu1  ;;  %v1980_v40 = vmul.f32 -0.5, %v2767_v38  ;;  %v1983_v4 = vand.u32 2147483647, %v2767_v38 }
 0x6f5   :  { %2776 = vlog2.f32 %v1950_v50  ;;  %v2337_v42 = vpop.f32.mrb[43].mxu1  ;;  %v1954_v17 = vadd.f32 1.0, %v1953_v29  ;;  %vm3696_vm4 = vcmp.lt.f32.partialorder %v1956_v31, 0.0004427343 }
 0x6f6   :  { %2778 = vlog2.f32 %v1977_v41  ;;  %v2769_v39 = vpop.eup %2768  ;;  %v1932_v15 = vmul.f32 1.442695, %v3688_v7  ;;  %v2338_v23 = vadd.f32 %v2337_v42, %v2336_v0  ;;  %v1981_v48 = vadd.f32 1.0, %v1980_v40 }
 0x6f7   :  { %2780 = vpow2.f32 %v1930_v56  ;;  %v2771_v2 = vpop.eup %2770  ;;  %v1959_v18 = vadd.f32 1.0, %v2769_v39  ;;  %v1962_v9 = vmul.f32 -0.5, %v2769_v39  ;;  %v1965_v54 = vand.u32 2147483647, %v2769_v39 }
 0x6f8   :  { %v2339_v30 = vpop.f32.mrb[44].mxu1  ;;  %v1986_v34 = vadd.f32 1.0, %v2771_v2  ;;  %v1989_v59 = vmul.f32 -0.5, %v2771_v2  ;;  %2782 = vpow2.f32 %v1932_v15  ;;  %v1992_v21 = vand.u32 2147483647, %v2771_v2 }
 0x6f9   :  { %v2340_v11 = vpop.f32.mrb[45].mxu1  ;;  %2784 = vlog2.f32 %v1959_v18  ;;  %vm3704_vm6 = vcmp.lt.f32.partialorder %v1983_v4, 0.0004427343  ;;  %v1963_v55 = vadd.f32 1.0, %v1962_v9  ;;  %v1955_v6 = vmul.f32 %v2765_v12, %v1954_v17 }
 0x6fa   :  { %v3693_v5 = vpop.eup %2772  ;;  %2786 = vlog2.f32 %v1986_v34  ;;  %v1990_v20 = vadd.f32 1.0, %v1989_v59  ;;  %v3713_v58 = vadd.f32 %v2338_v23, %v3654_v22  ;;  %vm3716_vm8 = vcmp.lt.f32.partialorder %v1965_v54, 0.0004427343 }
 0x6fb   :  { %v3700_v37 = vpop.eup %2774  ;;  %v1968_v28 = vadd.f32 1.0, %v3693_v5  ;;  %v1971_v52 = vmul.f32 -0.5, %v3693_v5  ;;  %v1974_v16 = vand.u32 2147483647, %v3693_v5  ;;  %vm3720_vm9 = vcmp.lt.f32.partialorder %v1992_v21, 0.0004427343 }
 0x6fc   :  { %v1995_v57 = vadd.f32 1.0, %v3700_v37  ;;  %v2342_v44 = vpop.f32.mrb[46].mxu1  ;;  %v1998_v43 = vmul.f32 -0.5, %v3700_v37  ;;  %v2341_v47 = vadd.f32 %v2340_v11, %v2339_v30  ;;  %v1982_v51 = vmul.f32 %v2767_v38, %v1981_v48 }
 0x6fd   :  { %2788 = vlog2.f32 %v1968_v28  ;;  %v2343_v25 = vpop.f32.mrb[47].mxu1  ;;  %v1964_v60 = vmul.f32 %v2769_v39, %v1963_v55  ;;  %v1934_v8 = vmul.f32 1.442695, %v3713_v58  ;;  %v1991_v33 = vmul.f32 %v2771_v2, %v1990_v20 }
 0x6fe   :  { %2790 = vlog2.f32 %v1995_v57  ;;  %v2344_v10 = vadd.f32 %v2343_v25, %v2342_v44  ;;  %v1972_v50 = vadd.f32 1.0, %v1971_v52  ;;  %v2001_v38 = vand.u32 2147483647, %v3700_v37 }
 0x6ff   :  { %v2777_v32 = vpop.eup %2776  ;;  %vm3740_vm13 = vcmp.lt.f32.partialorder %v1974_v16, 0.0004427343  ;;  %v1999_v13 = vadd.f32 1.0, %v1998_v43  ;;  %2792 = vpow2.f32 %v1934_v8  ;;  %v3754_v15 = vadd.f32 %v2341_v47, %v3654_v22 }
 0x700   :  { %v2779_v26 = vpop.eup %2778  ;;  %v1952_v49 = vmul.f32 0.6931472, %v2777_v32  ;;  %v2345_v27 = vpop.f32.mrb[48].mxu1  ;;  %vm3769_vm15 = vcmp.lt.f32.partialorder %v2001_v38, 0.0004427343  ;;  %v1973_v23 = vmul.f32 %v3693_v5, %v1972_v50  ;;  %v3780_v21 = vadd.f32 %v2344_v10, %v3654_v22 }
 0x701   :  { %v3726_v53 = vpop.eup %2780  ;;  %v1979_v36 = vmul.f32 0.6931472, %v2779_v26  ;;  %v2346_v41 = vpop.f32.mrb[49].mxu1  ;;  %v2000_v54 = vmul.f32 %v3700_v37, %v1999_v13  ;;  %v1936_v35 = vmul.f32 1.442695, %v3754_v15 }
 0x702   :  { %v1958_v56 = vsel %vm3696_vm4, %v1955_v6, %v1952_v49  ;;  %v2004_v0 = vadd.f32 1.0, %v3726_v53  ;;  %v3745_v31 = vpop.eup %2782  ;;  %v2007_v18 = vmul.f32 -0.5, %v3726_v53  ;;  %v2010_v48 = vand.u32 2147483647, %v3726_v53 }
 0x703   :  { %v2094_v42 = vsel %vm1902_vm3, %v3657_v1, %v1958_v56  ;;  %v1985_v39 = vsel %vm3704_vm6, %v1982_v51, %v1979_v36  ;;  %v2785_v2 = vpop.eup %2784  ;;  %v2013_v59 = vadd.f32 1.0, %v3745_v31  ;;  %v2016_v16 = vmul.f32 -0.5, %v3745_v31 }
 0x704   :  { %v2110_v40 = vsel %vm3732_vm11, %v2094_v42, %v3657_v1  ;;  %v2097_v4 = vsel %vm1905_vm5, %v3660_v61, %v1985_v39  ;;  %2794 = vlog2.f32 %v2004_v0  ;;  %v2348_v9 = vpop.f32.mrb[50].mxu1  ;;  %v2787_v30 = vpop.eup %2786  ;;  %v1961_v34 = vmul.f32 0.6931472, %v2785_v2 }
 0x705   :  { %2126 = vst [vmem:[%s3957_s6] sm:$0xff] %v2110_v40  ;;  %v2113_v17 = vsel %vm3732_vm11, %v2097_v4, %v3660_v61  ;;  %v2349_v11 = vpop.f32.mrb[51].mxu1  ;;  %v1988_v19 = vmul.f32 0.6931472, %v2787_v30  ;;  %2796 = vlog2.f32 %v2013_v59  ;;  %v2008_v44 = vadd.f32 1.0, %v2007_v18 }
 0x706   :  { %2129 = vst [vmem:[%s3957_s6 + $0x18] sm:$0xff] %v2113_v17  ;;  %v1967_v28 = vsel %vm3716_vm8, %v1964_v60, %v1961_v34  ;;  %2798 = vpow2.f32 %v1936_v35  ;;  %v1938_v10 = vmul.f32 1.442695, %v3780_v21  ;;  %v2350_v51 = vadd.f32 %v2349_v11, %v2348_v9 }
 0x707   :  { %v2789_v61 = vpop.eup %2788  ;;  %v2095_v57 = vsel %vm1903_vm7, %v3665_v62, %v1967_v28  ;;  %v1994_v5 = vsel %vm3720_vm9, %v1991_v33, %v1988_v19  ;;  %v2017_v33 = vadd.f32 1.0, %v2016_v16  ;;  %v2009_v13 = vmul.f32 %v3726_v53, %v2008_v44 }
 0x708   :  { %v2791_v55 = vpop.eup %2790  ;;  %v1970_v37 = vmul.f32 0.6931472, %v2789_v61  ;;  %v2351_v6 = vpop.f32.mrb[52].mxu1  ;;  %v2111_v20 = vsel %vm3732_vm11, %v2095_v57, %v3665_v62  ;;  %v2098_v52 = vsel %vm1906_vm10, %v3668_v14, %v1994_v5  ;;  %v2019_v62 = vand.u32 2147483647, %v3745_v31 }
 0x709   :  { %v1997_v25 = vmul.f32 0.6931472, %v2791_v55  ;;  %v2352_v43 = vpop.f32.mrb[53].mxu1  ;;  %2127 = vst [vmem:[%s3957_s6 + $0x8] sm:$0xff] %v2111_v20  ;;  %v2114_v32 = vsel %vm3732_vm11, %v2098_v52, %v3668_v14  ;;  %v2347_v14 = vadd.f32 %v2346_v41, %v2345_v27  ;;  %v2793_v36 = vpop.eup %2792  ;;  %2800 = vpow2.f32 %v1938_v10 }
 0x70a   :  { %v1976_v46 = vsel %vm3740_vm13, %v1973_v23, %v1970_v37  ;;  %2130 = vst [vmem:[%s3957_s6 + $0x20] sm:$0xff] %v2114_v32  ;;  %v2353_v60 = vadd.f32 %v2352_v43, %v2351_v6  ;;  %v2022_v41 = vadd.f32 1.0, %v2793_v36  ;;  %v3835_v56 = vadd.f32 %v2350_v51, %v3654_v22 }
 0x70b   :  { %v2096_v45 = vsel %vm1904_vm12, %v3673_v63, %v1976_v46  ;;  %v2003_v47 = vsel %vm3769_vm15, %v2000_v54, %v1997_v25  ;;  %vm2011_vm1 = vcmp.lt.f32.partialorder %v2010_v48, 0.0004427343  ;;  %vm3843_vm2 = vcmp.lt.f32.partialorder %v2019_v62, 0.0004427343 }
 0x70c   :  { %v2112_v26 = vsel %vm3732_vm11, %v2096_v45, %v3673_v63  ;;  %v2099_v49 = vsel %vm1907_vm14, %v3676_v3, %v2003_v47  ;;  %v2354_v8 = vpop.f32.mrb[54].mxu1  ;;  %v3829_v63 = vadd.f32 %v2347_v14, %v3654_v22  ;;  %v3840_v0 = vadd.f32 %v2353_v60, %v3654_v22 }
 0x70d   :  { %2128 = vst [vmem:[%s3957_s6 + $0x10] sm:$0xff] %v2112_v26  ;;  %v2115_v27 = vsel %vm3732_vm11, %v2099_v49, %v3676_v3  ;;  %v2355_v50 = vpop.f32.mrb[55].mxu1  ;;  %2802 = vlog2.f32 %v2022_v41  ;;  %v2018_v4 = vmul.f32 %v3745_v31, %v2017_v33  ;;  %v1942_v53 = vmul.f32 1.442695, %v3835_v56 }
 0x70e   :  { %v2795_v38 = vpop.eup %2794  ;;  %2131 = vst [vmem:[%s3957_s6 + $0x28] sm:$0xff] %v2115_v27  ;;  %v1940_v3 = vmul.f32 1.442695, %v3829_v63  ;;  %v2025_v17 = vmul.f32 -0.5, %v2793_v36  ;;  %v1944_v34 = vmul.f32 1.442695, %v3840_v0  ;;  %v2356_v59 = vadd.f32 %v2355_v50, %v2354_v8 }
 0x70f   :  { %v2006_v29 = vmul.f32 0.6931472, %v2795_v38  ;;  %v2797_v2 = vpop.eup %2796  ;;  %vm1909_vm3 = vcmp.gt.f32.partialorder %v3688_v7, 20.0  ;;  %v2028_v55 = vand.u32 2147483647, %v2793_v36  ;;  %vm1910_vm5 = vcmp.gt.f32.partialorder %v3713_v58, 20.0 }
 0x710   :  { %v2357_v39 = vpop.f32.mrb[56].mxu1  ;;  %2804 = vpow2.f32 %v1940_v3  ;;  %v2015_v30 = vmul.f32 0.6931472, %v2797_v2  ;;  %v2799_v19 = vpop.eup %2798  ;;  %v3865_v61 = vadd.f32 %v2356_v59, %v3654_v22  ;;  %v2026_v35 = vadd.f32 1.0, %v2025_v17 }
 0x711   :  { %v2012_v40 = vsel %vm2011_vm1, %v2009_v13, %v2006_v29  ;;  %v2358_v18 = vpop.f32.mrb[57].mxu1  ;;  %2806 = vpow2.f32 %v1942_v53  ;;  %v2031_v54 = vadd.f32 1.0, %v2799_v19  ;;  %v2034_v44 = vmul.f32 -0.5, %v2799_v19 }
 0x712   :  { %v2100_v9 = vsel %vm1908_vm0, %v3681_v24, %v2012_v40  ;;  %v2359_v11 = vadd.f32 %v2358_v18, %v2357_v39  ;;  %v2021_v31 = vsel %vm3843_vm2, %v2018_v4, %v2015_v30  ;;  %2808 = vpow2.f32 %v1944_v34 }
 0x713   :  { %v2116_v1 = vsel %vm3732_vm11, %v2100_v9, %v3681_v24  ;;  %v2101_v23 = vsel %vm1909_vm3, %v3688_v7, %v2021_v31  ;;  %v2801_v48 = vpop.eup %2800  ;;  %2810 = vlog2.f32 %v2031_v54  ;;  %v1946_v5 = vmul.f32 1.442695, %v3865_v61 }
 0x714   :  { %2132 = vst [vmem:[%s3957_s6 + $0x30] sm:$0xff] %v2116_v1  ;;  %v2117_v24 = vsel %vm3732_vm11, %v2101_v23, %v3688_v7  ;;  %v3868_v28 = vadd.f32 %v2359_v11, %v3654_v22  ;;  %v2040_v57 = vadd.f32 1.0, %v2801_v48  ;;  %v2027_v22 = vmul.f32 %v2793_v36, %v2026_v35 }
 0x715   :  { %2133 = vst [vmem:[%s3957_s6 + $0x38] sm:$0xff] %v2117_v24  ;;  %vm2029_vm4 = vcmp.lt.f32.partialorder %v2028_v55, 0.0004427343  ;;  %v2043_v43 = vmul.f32 -0.5, %v2801_v48  ;;  %v2035_v62 = vadd.f32 1.0, %v2034_v44  ;;  %vm1911_vm7 = vcmp.gt.f32.partialorder %v3754_v15, 20.0 }
 0x716   :  { %v1948_v37 = vmul.f32 1.442695, %v3868_v28  ;;  %2812 = vlog2.f32 %v2040_v57  ;;  %v2037_v47 = vand.u32 2147483647, %v2799_v19  ;;  %v2046_v36 = vand.u32 2147483647, %v2801_v48 }
 0x717   :  { %v2803_v7 = vpop.eup %2802  ;;  %2814 = vpow2.f32 %v1946_v5  ;;  %v2044_v51 = vadd.f32 1.0, %v2043_v43  ;;  %v2036_v8 = vmul.f32 %v2799_v19, %v2035_v62  ;;  %vm1912_vm9 = vcmp.gt.f32.partialorder %v3780_v21, 20.0 }
 0x718   :  { %v2024_v20 = vmul.f32 0.6931472, %v2803_v7  ;;  %2816 = vpow2.f32 %v1948_v37  ;;  %vm2038_vm6 = vcmp.lt.f32.partialorder %v2037_v47, 0.0004427343  ;;  %vm2047_vm8 = vcmp.lt.f32.partialorder %v2046_v36, 0.0004427343 }
 0x719   :  { %v2045_v13 = vmul.f32 %v2801_v48, %v2044_v51  ;;  %vm1913_vm12 = vcmp.gt.f32.partialorder %v3829_v63, 20.0  ;;  %vm1914_vm14 = vcmp.gt.f32.partialorder %v3835_v56, 20.0  ;;  %vm1915_vm0 = vcmp.gt.f32.partialorder %v3840_v0, 20.0 }
 0x71a   :  { %v2805_v6 = vpop.eup %2804  ;;  %v2030_v16 = vsel %vm2029_vm4, %v2027_v22, %v2024_v20  ;;  %vm1916_vm2 = vcmp.gt.f32.partialorder %v3865_v61, 20.0  ;;  %vm1917_vm4 = vcmp.gt.f32.partialorder %v3868_v28, 20.0 }
 0x71b   :  { %v2049_v52 = vadd.f32 1.0, %v2805_v6  ;;  %v3875_v25 = vpop.eup %2806  ;;  %v2102_v46 = vsel %vm1910_vm5, %v3713_v58, %v2030_v16  ;;  %v2052_v14 = vmul.f32 -0.5, %v2805_v6  ;;  %v2055_v39 = vand.u32 2147483647, %v2805_v6 }
 0x71c   :  { %v3878_v32 = vpop.eup %2808  ;;  %v2118_v45 = vsel %vm3732_vm11, %v2102_v46, %v3713_v58  ;;  %v2058_v10 = vadd.f32 1.0, %v3875_v25  ;;  %v2061_v50 = vmul.f32 -0.5, %v3875_v25  ;;  %v2064_v53 = vand.u32 2147483647, %v3875_v25 }
 0x71d   :  { %2818 = vlog2.f32 %v2049_v52  ;;  %2134 = vst [vmem:[%s3957_s6 + $0x40] sm:$0xff] %v2118_v45  ;;  %v2067_v26 = vadd.f32 1.0, %v3878_v32  ;;  %v2811_v49 = vpop.eup %2810  ;;  %v2053_v33 = vadd.f32 1.0, %v2052_v14  ;;  %v2070_v3 = vmul.f32 -0.5, %v3878_v32 }
 0x71e   :  { %2820 = vlog2.f32 %v2058_v10  ;;  %v2033_v60 = vmul.f32 0.6931472, %v2811_v49  ;;  %v2062_v17 = vadd.f32 1.0, %v2061_v50  ;;  %vm2056_vm10 = vcmp.lt.f32.partialorder %v2055_v39, 0.0004427343 }
 0x71f   :  { %2822 = vlog2.f32 %v2067_v26  ;;  %v2054_v30 = vmul.f32 %v2805_v6, %v2053_v33  ;;  %v2071_v1 = vadd.f32 1.0, %v2070_v3  ;;  %v2073_v11 = vand.u32 2147483647, %v3878_v32 }
 0x720   :  { %v2813_v27 = vpop.eup %2812  ;;  %v2039_v58 = vsel %vm2038_vm6, %v2036_v8, %v2033_v60  ;;  %v2063_v48 = vmul.f32 %v3875_v25, %v2062_v17  ;;  %vm2065_vm13 = vcmp.lt.f32.partialorder %v2064_v53, 0.0004427343 }
 0x721   :  { %v2815_v38 = vpop.eup %2814  ;;  %v2103_v41 = vsel %vm1911_vm7, %v3754_v15, %v2039_v58  ;;  %v2042_v29 = vmul.f32 0.6931472, %v2813_v27  ;;  %v2072_v57 = vmul.f32 %v3878_v32, %v2071_v1  ;;  %vm2074_vm15 = vcmp.lt.f32.partialorder %v2073_v11, 0.0004427343 }
 0x722   :  { %v2119_v42 = vsel %vm3732_vm11, %v2103_v41, %v3754_v15  ;;  %v2076_v2 = vadd.f32 1.0, %v2815_v38  ;;  %v2817_v40 = vpop.eup %2816  ;;  %v2079_v23 = vmul.f32 -0.5, %v2815_v38  ;;  %v2082_v22 = vand.u32 2147483647, %v2815_v38 }
 0x723   :  { %2135 = vst [vmem:[%s3957_s6 + $0x48] sm:$0xff] %v2119_v42  ;;  %v2048_v4 = vsel %vm2047_vm8, %v2045_v13, %v2042_v29  ;;  %v2085_v59 = vadd.f32 1.0, %v2817_v40  ;;  %v2088_v37 = vmul.f32 -0.5, %v2817_v40 }
 0x724   :  { %v2104_v9 = vsel %vm1912_vm9, %v3780_v21, %v2048_v4  ;;  %2824 = vlog2.f32 %v2076_v2  ;;  %v2080_v6 = vadd.f32 1.0, %v2079_v23  ;;  %vm2083_vm1 = vcmp.lt.f32.partialorder %v2082_v22, 0.0004427343 }
 0x725   :  { %v2120_v15 = vsel %vm3732_vm11, %v2104_v9, %v3780_v21  ;;  %2826 = vlog2.f32 %v2085_v59  ;;  %v2089_v16 = vadd.f32 1.0, %v2088_v37 }
 0x726   :  { %2136 = vst [vmem:[%s3957_s6 + $0x50] sm:$0xff] %v2120_v15  ;;  %v2081_v32 = vmul.f32 %v2815_v38, %v2080_v6 }
 0x727   :  { %v2819_v18 = vpop.eup %2818  ;;  %v2090_v10 = vmul.f32 %v2817_v40, %v2089_v16 }
 0x728   :  { %v2051_v34 = vmul.f32 0.6931472, %v2819_v18  ;;  %v2821_v19 = vpop.eup %2820 }
 0x729   :  { %v2823_v54 = vpop.eup %2822  ;;  %v2060_v21 = vmul.f32 0.6931472, %v2821_v19 }
 0x72a   :  { %v2057_v31 = vsel %vm2056_vm10, %v2054_v30, %v2051_v34  ;;  %v2069_v55 = vmul.f32 0.6931472, %v2823_v54 }
 0x72b   :  { %v2105_v24 = vsel %vm1913_vm12, %v3829_v63, %v2057_v31  ;;  %v2066_v5 = vsel %vm2065_vm13, %v2063_v48, %v2060_v21 }
 0x72c   :  { %v2121_v35 = vsel %vm3732_vm11, %v2105_v24, %v3829_v63  ;;  %v2106_v7 = vsel %vm1914_vm14, %v3835_v56, %v2066_v5  ;;  %v2075_v44 = vsel %vm2074_vm15, %v2072_v57, %v2069_v55 }
 0x72d   :  { %2137 = vst [vmem:[%s3957_s6 + $0x58] sm:$0xff] %v2121_v35  ;;  %v2122_v63 = vsel %vm3732_vm11, %v2106_v7, %v3835_v56  ;;  %v2107_v20 = vsel %vm1915_vm0, %v3840_v0, %v2075_v44  ;;  %v2091_v56 = vand.u32 2147483647, %v2817_v40 }
 0x72e   :  { %2138 = vst [vmem:[%s3957_s6 + $0x60] sm:$0xff] %v2122_v63  ;;  %v2123_v52 = vsel %vm3732_vm11, %v2107_v20, %v3840_v0  ;;  %v2825_v25 = vpop.eup %2824 }
 0x72f   :  { %2139 = vst [vmem:[%s3957_s6 + $0x68] sm:$0xff] %v2123_v52  ;;  %v2078_v43 = vmul.f32 0.6931472, %v2825_v25  ;;  %v2827_v46 = vpop.eup %2826  ;;  %vm2092_vm3 = vcmp.lt.f32.partialorder %v2091_v56, 0.0004427343 }
 0x730   :  { %v2087_v47 = vmul.f32 0.6931472, %v2827_v46 }
 0x731   :  { %v2084_v62 = vsel %vm2083_vm1, %v2081_v32, %v2078_v43 }
 0x732   :  { %v2108_v45 = vsel %vm1916_vm2, %v3865_v61, %v2084_v62  ;;  %v2093_v14 = vsel %vm2092_vm3, %v2090_v10, %v2087_v47 }
 0x733   :  { %v2124_v0 = vsel %vm3732_vm11, %v2108_v45, %v3865_v61  ;;  %v2109_v26 = vsel %vm1917_vm4, %v3868_v28, %v2093_v14 }
 0x734   :  { %2140 = vst [vmem:[%s3957_s6 + $0x70] sm:$0xff] %v2124_v0  ;;  %v2125_v49 = vsel %vm3732_vm11, %v2109_v26, %v3868_v28 }
 0x735   :  { %2141 = vst [vmem:[%s3957_s6 + $0x78] sm:$0xff] %v2125_v49 }
 0x736   :  { %2146 = vsyncpa [#allocation3], 1 }
 0x737   :  { %2147 = vsyncpa [#allocation5], 1 }

</bundles_post_ra>
